<compile_context>
chip_gen: v7x
topology: tpu7x:2x2x1
jax: 0.10.0
libtpu: 0.0.40
codegen_flags: <defaults>
</compile_context>

<pallas_src>
import jax
import jax.numpy as jnp
import numpy as np
from jax.experimental import pallas as pl
from jax.experimental.pallas import tpu as pltpu

# ---------------------------------------------------------------------------
# Static problem configuration (the deterministic submodule instantiated here)
# ---------------------------------------------------------------------------
N = 2                       # batch
C0, H0, W0 = 4, 16, 16      # input channels / spatial
C1 = 8                      # conv1 output channels
C2 = 16                     # conv2 output channels
F1, F2 = 32, 10             # fc1 / fc2 widths
KS = 3                      # conv kernel size (3x3, padding=1)

HP1, WP1 = H0 + 2, W0 + 2           # padded conv1 spatial     (18, 18)
MP1 = N * HP1 * WP1                 # padded-flat length conv1 (648)
E1 = WP1 + 1                        # extra end pad for taps   (19)
L1 = MP1 - E1                       # pool1 shifted-slice len  (629)

H1o, W1o = H0 // 2, W0 // 2         # pool1 spatial            (8, 8)
HP2, WP2 = H1o + 2, W1o + 2         # padded conv2 spatial     (10, 10)
MP2 = N * HP2 * WP2                 # padded-flat length conv2 (200)
E2 = WP2 + 1                        # extra end pad            (11)
L2 = MP2 - E2                       # pool2 shifted-slice len  (189)

H2o, W2o = H1o // 2, W1o // 2       # pool2 spatial            (4, 4)
HW2o = H2o * W2o                    # 16
FLAT = C2 * HW2o                    # fc1 input features       (256)


# ---------------------------------------------------------------------------
# 0/1 selection matrices: "pick 2x2 window-base columns, subsample stride-2 and
# re-embed into the next layer's zero-padded flat layout" -- built once in
# numpy, folded as constants.  Turns pooling subsample + re-pad into one matmul.
# ---------------------------------------------------------------------------
def _build_pool1_select():
    s = np.zeros((L1, 2 * E2 + MP2), np.float32)
    for n in range(N):
        for hp in range(1, H1o + 1):          # conv2-input padded row (interior)
            for wp in range(1, W1o + 1):
                dst = E2 + n * HP2 * WP2 + hp * WP2 + wp
                src = n * HP1 * WP1 + (2 * hp - 1) * WP1 + (2 * wp - 1)
                s[src, dst] = 1.0
    return s


def _build_pool2_select():
    s = np.zeros((L2, N * HW2o), np.float32)
    for n in range(N):
        for ho in range(H2o):
            for wo in range(W2o):
                dst = n * HW2o + ho * W2o + wo
                src = n * HP2 * WP2 + (2 * ho + 1) * WP2 + (2 * wo + 1)
                s[src, dst] = 1.0
    return s


_S1 = _build_pool1_select()    # (629, 222)
_S2 = _build_pool2_select()    # (189, 32)


# ---------------------------------------------------------------------------
# The fused Pallas kernel (grid-less, everything in VMEM)
# ---------------------------------------------------------------------------
def _fused_cnn_kernel(x_ref, w1_ref, b1_ref, s1_ref, w2_ref, b2_ref, s2_ref,
                      wf1_ref, bf1_ref, wf2_ref, bf2_ref,
                      relu1_ref, pool2_ref, fc1_ref, fc2_ref,
                      flat_ref):
    x = x_ref[...]                                          # (C0, E1 + MP1 + E1)

    # ---- conv1 + bias + ReLU (computed at every padded-flat position) ------
    # in-kernel im2col: each tap is a contiguous lane-offset slice.
    acc1 = jnp.zeros((C1, MP1), jnp.float32)
    for kh in range(KS):
        for kw in range(KS):
            off = E1 + (kh - 1) * WP1 + (kw - 1)
            acc1 = acc1 + jnp.dot(w1_ref[kh, kw, :, :], x[:, off:off + MP1],
                                  preferred_element_type=jnp.float32)
    relu1 = jnp.maximum(acc1 + b1_ref[...], 0.0)            # (C1, MP1)
    relu1_ref[...] = relu1                                  # extracted ("relu1")

    # ---- pool1 (2x2/2 max) fused: 4 lane-shifted slices + selection matmul --
    p1 = jnp.maximum(
        jnp.maximum(relu1[:, 0:L1], relu1[:, 1:1 + L1]),
        jnp.maximum(relu1[:, WP1:WP1 + L1], relu1[:, WP1 + 1:WP1 + 1 + L1]))
    conv2_in = jnp.dot(p1, s1_ref[...],
                       preferred_element_type=jnp.float32)  # (C1, 2*E2 + MP2)

    # ---- conv2 + bias + ReLU ------------------------------------------------
    acc2 = jnp.zeros((C2, MP2), jnp.float32)
    for kh in range(KS):
        for kw in range(KS):
            off = E2 + (kh - 1) * WP2 + (kw - 1)
            acc2 = acc2 + jnp.dot(w2_ref[kh, kw, :, :],
                                  conv2_in[:, off:off + MP2],
                                  preferred_element_type=jnp.float32)
    relu2 = jnp.maximum(acc2 + b2_ref[...], 0.0)            # (C2, MP2)

    # ---- pool2 + selection down to (C2, N*H2o*W2o) --------------------------
    p2f = jnp.maximum(
        jnp.maximum(relu2[:, 0:L2], relu2[:, 1:1 + L2]),
        jnp.maximum(relu2[:, WP2:WP2 + L2], relu2[:, WP2 + 1:WP2 + 1 + L2]))
    p2 = jnp.dot(p2f, s2_ref[...],
                 preferred_element_type=jnp.float32)        # (C2, N*HW2o)
    pool2_ref[...] = p2                                     # extracted ("pool2")

    # ---- flatten to torch's x.view(N, -1) order (c, h, w) via VMEM scratch --
    for n in range(N):
        for c in range(C2):
            flat_ref[n:n + 1, c * HW2o:(c + 1) * HW2o] = \
                p2[c:c + 1, n * HW2o:(n + 1) * HW2o]
    flat = flat_ref[...]                                    # (N, FLAT)

    # ---- fc1 (extracted), relu3, fc2 ----------------------------------------
    fc1 = jnp.dot(flat, wf1_ref[...],
                  preferred_element_type=jnp.float32) + bf1_ref[...]
    fc1_ref[...] = fc1                                      # extracted ("fc1")
    fc2_ref[...] = (jnp.dot(jnp.maximum(fc1, 0.0), wf2_ref[...],
                            preferred_element_type=jnp.float32) + bf2_ref[...])


def _full_vmem_spec(shape):
    zeros = (0,) * len(shape)
    return pl.BlockSpec(shape, lambda *_: zeros,
                        memory_space=pltpu.MemorySpace.VMEM)


def _fused_forward(params, x):
    """Runs the whole submodule forward in one pallas_call.

    Returns a dict with the layer outputs the fused kernel exposes."""
    # --- tiny XLA-side layout glue (O(10 KB)) --------------------------------
    xp = jnp.pad(x.astype(jnp.float32), ((0, 0), (0, 0), (1, 1), (1, 1)))
    x1 = jnp.pad(xp.transpose(1, 0, 2, 3).reshape(C0, MP1), ((0, 0), (E1, E1)))

    w1k = params["conv1_w"].transpose(2, 3, 0, 1)   # (3, 3, C1, C0)
    w2k = params["conv2_w"].transpose(2, 3, 0, 1)   # (3, 3, C2, C1)
    b1k = params["conv1_b"].reshape(C1, 1)
    b2k = params["conv2_b"].reshape(C2, 1)
    wf1 = params["fc1_w"].T                         # (FLAT, F1)
    bf1 = params["fc1_b"].reshape(1, F1)
    wf2 = params["fc2_w"].T                         # (F1, F2)
    bf2 = params["fc2_b"].reshape(1, F2)
    s1 = jnp.asarray(_S1)
    s2 = jnp.asarray(_S2)

    in_arrays = (x1, w1k, b1k, s1, w2k, b2k, s2, wf1, bf1, wf2, bf2)
    out_shapes = (
        jax.ShapeDtypeStruct((C1, MP1), jnp.float32),       # relu1 (padded-flat)
        jax.ShapeDtypeStruct((C2, N * HW2o), jnp.float32),  # pool2
        jax.ShapeDtypeStruct((N, F1), jnp.float32),         # fc1
        jax.ShapeDtypeStruct((N, F2), jnp.float32),         # fc2
    )
    relu1_pf, p2, fc1, fc2 = pl.pallas_call(
        _fused_cnn_kernel,
        out_shape=out_shapes,
        in_specs=[_full_vmem_spec(a.shape) for a in in_arrays],
        out_specs=tuple(_full_vmem_spec(s.shape) for s in out_shapes),
        scratch_shapes=[pltpu.VMEM((N, FLAT), jnp.float32)],
    )(*in_arrays)

    # --- back to the PyTorch NCHW layouts (tiny XLA reshapes/transposes) -----
    relu1 = (relu1_pf.reshape(C1, N, HP1, WP1)[:, :, 1:H0 + 1, 1:W0 + 1]
             .transpose(1, 0, 2, 3))                        # (N, C1, 16, 16)
    pool2 = p2.reshape(C2, N, H2o, W2o).transpose(1, 0, 2, 3)  # (N, C2, 4, 4)
    return {"relu1": relu1, "pool2": pool2, "fc1": fc1, "fc2": fc2}


# ---------------------------------------------------------------------------
# Deterministic submodule parameters + FeatureExtractor replica
# ---------------------------------------------------------------------------
def make_submodule_params():
    key = jax.random.PRNGKey(0)
    ks = jax.random.split(key, 8)
    return {
        "conv1_w": 0.1 * jax.random.normal(ks[0], (C1, C0, KS, KS), jnp.float32),
        "conv1_b": 0.1 * jax.random.normal(ks[1], (C1,), jnp.float32),
        "conv2_w": 0.1 * jax.random.normal(ks[2], (C2, C1, KS, KS), jnp.float32),
        "conv2_b": 0.1 * jax.random.normal(ks[3], (C2,), jnp.float32),
        "fc1_w": 0.05 * jax.random.normal(ks[4], (F1, FLAT), jnp.float32),
        "fc1_b": 0.05 * jax.random.normal(ks[5], (F1,), jnp.float32),
        "fc2_w": 0.05 * jax.random.normal(ks[6], (F2, F1), jnp.float32),
        "fc2_b": 0.05 * jax.random.normal(ks[7], (F2,), jnp.float32),
    }


_LAYER_ORDER = ("conv1", "relu1", "pool1", "conv2", "relu2", "pool2",
                "fc1", "relu3", "fc2")
_EXPOSED = ("relu1", "pool2", "fc1", "fc2")


class FeatureExtractor:
    """JAX/Pallas replica of the PyTorch FeatureExtractor forward pass,
    specialized to the deterministic CNN submodule defined in this script and
    fused into a single TPU kernel."""

    def __init__(self, submodule_params, extracted_layers):
        self.params = submodule_params
        self.extracted_layers = list(extracted_layers)
        unsupported = [l for l in self.extracted_layers if l not in _EXPOSED]
        if unsupported:
            # TODO(synk): the fully generic FeatureExtractor over arbitrary
            # user submodules / extraction points is Python dispatch in
            # PyTorch; the fused kernel only exposes {relu1, pool2, fc1, fc2}.
            raise NotImplementedError(f"unsupported extraction points: {unsupported}")
        self._fwd = jax.jit(_fused_forward)

    def __call__(self, x):
        feats = self._fwd(self.params, x)
        # same semantics as the PyTorch loop: outputs in forward order, the
        # flatten before 'fc' matches x.view(N, -1) on NCHW, fc2 is computed
        # but only extracted layers are returned.
        # TODO(synk): the PyTorch forward also print()s module metadata;
        # host-side printing is intentionally omitted (no compute semantics).
        return [feats[name] for name in _LAYER_ORDER
                if name in self.extracted_layers]


# ---------------------------------------------------------------------------
# Pure-JAX reference of the same forward (for a numerical self-check)
# ---------------------------------------------------------------------------
def _reference_forward(params, x):
    def conv(a, w, b):
        out = jax.lax.conv_general_dilated(
            a, w, window_strides=(1, 1), padding=((1, 1), (1, 1)),
            dimension_numbers=("NCHW", "OIHW", "NCHW"),
            precision=jax.lax.Precision.HIGHEST)
        return out + b.reshape(1, -1, 1, 1)

    def pool(a):
        n, c, h, w = a.shape
        return a.reshape(n, c, h // 2, 2, w // 2, 2).max(axis=(3, 5))

    r1 = jax.nn.relu(conv(x, params["conv1_w"], params["conv1_b"]))
    p1 = pool(r1)
    r2 = jax.nn.relu(conv(p1, params["conv2_w"], params["conv2_b"]))
    p2 = pool(r2)
    flat = p2.reshape(x.shape[0], -1)
    fc1 = jnp.dot(flat, params["fc1_w"].T,
                  precision=jax.lax.Precision.HIGHEST) + params["fc1_b"]
    return [r1, p2, fc1]


# ---------------------------------------------------------------------------

if __name__ == "__main__":
    params = make_submodule_params()
    extractor = FeatureExtractor(params, extracted_layers=["relu1", "pool2", "fc1"])

    x = jax.random.normal(jax.random.PRNGKey(0), (N, C0, H0, W0), jnp.float32)

    feats = extractor(x)
    for f in feats:
        jax.block_until_ready(f)

    expected_shapes = [(2, 8, 16, 16), (2, 16, 4, 4), (2, 32)]
    assert [tuple(f.shape) for f in feats] == expected_shapes, \
        [tuple(f.shape) for f in feats]

    refs = _reference_forward(params, x)
    for got, want in zip(feats, refs):
        assert bool(jnp.all(jnp.isfinite(got)))
        assert bool(jnp.allclose(got, want, rtol=1e-2, atol=1e-2)), \
            float(jnp.max(jnp.abs(got - want)))

    print("KERNEL_OK")
</pallas_src>

<mosaic_0001>
module attributes {stable_mosaic.version = 11 : i64} {
  func.func @_fused_cnn_kernel(%arg0: memref<4x686xf32, #tpu.memory_space<vmem>>, %arg1: memref<3x3x8x4xf32, #tpu.memory_space<vmem>>, %arg2: memref<8x1xf32, #tpu.memory_space<vmem>>, %arg3: memref<629x222xf32, #tpu.memory_space<vmem>>, %arg4: memref<3x3x16x8xf32, #tpu.memory_space<vmem>>, %arg5: memref<16x1xf32, #tpu.memory_space<vmem>>, %arg6: memref<189x32xf32, #tpu.memory_space<vmem>>, %arg7: memref<256x32xf32, #tpu.memory_space<vmem>>, %arg8: memref<1x32xf32, #tpu.memory_space<vmem>>, %arg9: memref<32x10xf32, #tpu.memory_space<vmem>>, %arg10: memref<1x10xf32, #tpu.memory_space<vmem>>, %arg11: memref<8x648xf32, #tpu.memory_space<vmem>>, %arg12: memref<16x32xf32, #tpu.memory_space<vmem>>, %arg13: memref<2x32xf32, #tpu.memory_space<vmem>>, %arg14: memref<2x10xf32, #tpu.memory_space<vmem>>, %arg15: memref<2x256xf32, #tpu.memory_space<vmem>>) attributes {dimension_semantics = [], scalar_prefetch = 0 : i64, scratch_operands = 1 : i64, tpu.core_type = #tpu.core_type<tc>} {
    %c0 = arith.constant 0 : index
    %c0_0 = arith.constant 0 : index
    %0 = vector.load %arg0[%c0, %c0_0] : memref<4x686xf32, #tpu.memory_space<vmem>>, vector<4x686xf32>
    %cst = arith.constant 0.000000e+00 : f32
    %1 = vector.broadcast %cst : f32 to vector<8x648xf32>
    %c0_1 = arith.constant 0 : index
    %c0_2 = arith.constant 0 : index
    %c0_3 = arith.constant 0 : index
    %c0_4 = arith.constant 0 : index
    %2 = vector.load %arg1[%c0_1, %c0_2, %c0_3, %c0_4] : memref<3x3x8x4xf32, #tpu.memory_space<vmem>>, vector<1x1x8x4xf32>
    %3 = vector.shape_cast %2 : vector<1x1x8x4xf32> to vector<8x4xf32>
    %4 = vector.extract_strided_slice %0 {offsets = [0, 0], sizes = [4, 648], strides = [1, 1]} : vector<4x686xf32> to vector<4x648xf32>
    %cst_5 = arith.constant dense<0.000000e+00> : vector<8x648xf32>
    %5 = tpu.matmul %3, %4, %cst_5 {dimension_numbers = #tpu.dot_dimension_numbers<[1], [0], [0], [1], [0, 0, 1, 1], [], []>} : vector<8x4xf32>, vector<4x648xf32>, vector<8x648xf32> -> vector<8x648xf32>
    %6 = arith.addf %1, %5 : vector<8x648xf32>
    %c0_6 = arith.constant 0 : index
    %c1 = arith.constant 1 : index
    %c0_7 = arith.constant 0 : index
    %c0_8 = arith.constant 0 : index
    %7 = vector.load %arg1[%c0_6, %c1, %c0_7, %c0_8] : memref<3x3x8x4xf32, #tpu.memory_space<vmem>>, vector<1x1x8x4xf32>
    %8 = vector.shape_cast %7 : vector<1x1x8x4xf32> to vector<8x4xf32>
    %9 = vector.extract_strided_slice %0 {offsets = [0, 1], sizes = [4, 648], strides = [1, 1]} : vector<4x686xf32> to vector<4x648xf32>
    %cst_9 = arith.constant dense<0.000000e+00> : vector<8x648xf32>
    %10 = tpu.matmul %8, %9, %cst_9 {dimension_numbers = #tpu.dot_dimension_numbers<[1], [0], [0], [1], [0, 0, 1, 1], [], []>} : vector<8x4xf32>, vector<4x648xf32>, vector<8x648xf32> -> vector<8x648xf32>
    %11 = arith.addf %6, %10 : vector<8x648xf32>
    %c0_10 = arith.constant 0 : index
    %c2 = arith.constant 2 : index
    %c0_11 = arith.constant 0 : index
    %c0_12 = arith.constant 0 : index
    %12 = vector.load %arg1[%c0_10, %c2, %c0_11, %c0_12] : memref<3x3x8x4xf32, #tpu.memory_space<vmem>>, vector<1x1x8x4xf32>
    %13 = vector.shape_cast %12 : vector<1x1x8x4xf32> to vector<8x4xf32>
    %14 = vector.extract_strided_slice %0 {offsets = [0, 2], sizes = [4, 648], strides = [1, 1]} : vector<4x686xf32> to vector<4x648xf32>
    %cst_13 = arith.constant dense<0.000000e+00> : vector<8x648xf32>
    %15 = tpu.matmul %13, %14, %cst_13 {dimension_numbers = #tpu.dot_dimension_numbers<[1], [0], [0], [1], [0, 0, 1, 1], [], []>} : vector<8x4xf32>, vector<4x648xf32>, vector<8x648xf32> -> vector<8x648xf32>
    %16 = arith.addf %11, %15 : vector<8x648xf32>
    %c1_14 = arith.constant 1 : index
    %c0_15 = arith.constant 0 : index
    %c0_16 = arith.constant 0 : index
    %c0_17 = arith.constant 0 : index
    %17 = vector.load %arg1[%c1_14, %c0_15, %c0_16, %c0_17] : memref<3x3x8x4xf32, #tpu.memory_space<vmem>>, vector<1x1x8x4xf32>
    %18 = vector.shape_cast %17 : vector<1x1x8x4xf32> to vector<8x4xf32>
    %19 = vector.extract_strided_slice %0 {offsets = [0, 18], sizes = [4, 648], strides = [1, 1]} : vector<4x686xf32> to vector<4x648xf32>
    %cst_18 = arith.constant dense<0.000000e+00> : vector<8x648xf32>
    %20 = tpu.matmul %18, %19, %cst_18 {dimension_numbers = #tpu.dot_dimension_numbers<[1], [0], [0], [1], [0, 0, 1, 1], [], []>} : vector<8x4xf32>, vector<4x648xf32>, vector<8x648xf32> -> vector<8x648xf32>
    %21 = arith.addf %16, %20 : vector<8x648xf32>
    %c1_19 = arith.constant 1 : index
    %c1_20 = arith.constant 1 : index
    %c0_21 = arith.constant 0 : index
    %c0_22 = arith.constant 0 : index
    %22 = vector.load %arg1[%c1_19, %c1_20, %c0_21, %c0_22] : memref<3x3x8x4xf32, #tpu.memory_space<vmem>>, vector<1x1x8x4xf32>
    %23 = vector.shape_cast %22 : vector<1x1x8x4xf32> to vector<8x4xf32>
    %24 = vector.extract_strided_slice %0 {offsets = [0, 19], sizes = [4, 648], strides = [1, 1]} : vector<4x686xf32> to vector<4x648xf32>
    %cst_23 = arith.constant dense<0.000000e+00> : vector<8x648xf32>
    %25 = tpu.matmul %23, %24, %cst_23 {dimension_numbers = #tpu.dot_dimension_numbers<[1], [0], [0], [1], [0, 0, 1, 1], [], []>} : vector<8x4xf32>, vector<4x648xf32>, vector<8x648xf32> -> vector<8x648xf32>
    %26 = arith.addf %21, %25 : vector<8x648xf32>
    %c1_24 = arith.constant 1 : index
    %c2_25 = arith.constant 2 : index
    %c0_26 = arith.constant 0 : index
    %c0_27 = arith.constant 0 : index
    %27 = vector.load %arg1[%c1_24, %c2_25, %c0_26, %c0_27] : memref<3x3x8x4xf32, #tpu.memory_space<vmem>>, vector<1x1x8x4xf32>
    %28 = vector.shape_cast %27 : vector<1x1x8x4xf32> to vector<8x4xf32>
    %29 = vector.extract_strided_slice %0 {offsets = [0, 20], sizes = [4, 648], strides = [1, 1]} : vector<4x686xf32> to vector<4x648xf32>
    %cst_28 = arith.constant dense<0.000000e+00> : vector<8x648xf32>
    %30 = tpu.matmul %28, %29, %cst_28 {dimension_numbers = #tpu.dot_dimension_numbers<[1], [0], [0], [1], [0, 0, 1, 1], [], []>} : vector<8x4xf32>, vector<4x648xf32>, vector<8x648xf32> -> vector<8x648xf32>
    %31 = arith.addf %26, %30 : vector<8x648xf32>
    %c2_29 = arith.constant 2 : index
    %c0_30 = arith.constant 0 : index
    %c0_31 = arith.constant 0 : index
    %c0_32 = arith.constant 0 : index
    %32 = vector.load %arg1[%c2_29, %c0_30, %c0_31, %c0_32] : memref<3x3x8x4xf32, #tpu.memory_space<vmem>>, vector<1x1x8x4xf32>
    %33 = vector.shape_cast %32 : vector<1x1x8x4xf32> to vector<8x4xf32>
    %34 = vector.extract_strided_slice %0 {offsets = [0, 36], sizes = [4, 648], strides = [1, 1]} : vector<4x686xf32> to vector<4x648xf32>
    %cst_33 = arith.constant dense<0.000000e+00> : vector<8x648xf32>
    %35 = tpu.matmul %33, %34, %cst_33 {dimension_numbers = #tpu.dot_dimension_numbers<[1], [0], [0], [1], [0, 0, 1, 1], [], []>} : vector<8x4xf32>, vector<4x648xf32>, vector<8x648xf32> -> vector<8x648xf32>
    %36 = arith.addf %31, %35 : vector<8x648xf32>
    %c2_34 = arith.constant 2 : index
    %c1_35 = arith.constant 1 : index
    %c0_36 = arith.constant 0 : index
    %c0_37 = arith.constant 0 : index
    %37 = vector.load %arg1[%c2_34, %c1_35, %c0_36, %c0_37] : memref<3x3x8x4xf32, #tpu.memory_space<vmem>>, vector<1x1x8x4xf32>
    %38 = vector.shape_cast %37 : vector<1x1x8x4xf32> to vector<8x4xf32>
    %39 = vector.extract_strided_slice %0 {offsets = [0, 37], sizes = [4, 648], strides = [1, 1]} : vector<4x686xf32> to vector<4x648xf32>
    %cst_38 = arith.constant dense<0.000000e+00> : vector<8x648xf32>
    %40 = tpu.matmul %38, %39, %cst_38 {dimension_numbers = #tpu.dot_dimension_numbers<[1], [0], [0], [1], [0, 0, 1, 1], [], []>} : vector<8x4xf32>, vector<4x648xf32>, vector<8x648xf32> -> vector<8x648xf32>
    %41 = arith.addf %36, %40 : vector<8x648xf32>
    %c2_39 = arith.constant 2 : index
    %c2_40 = arith.constant 2 : index
    %c0_41 = arith.constant 0 : index
    %c0_42 = arith.constant 0 : index
    %42 = vector.load %arg1[%c2_39, %c2_40, %c0_41, %c0_42] : memref<3x3x8x4xf32, #tpu.memory_space<vmem>>, vector<1x1x8x4xf32>
    %43 = vector.shape_cast %42 : vector<1x1x8x4xf32> to vector<8x4xf32>
    %44 = vector.extract_strided_slice %0 {offsets = [0, 38], sizes = [4, 648], strides = [1, 1]} : vector<4x686xf32> to vector<4x648xf32>
    %cst_43 = arith.constant dense<0.000000e+00> : vector<8x648xf32>
    %45 = tpu.matmul %43, %44, %cst_43 {dimension_numbers = #tpu.dot_dimension_numbers<[1], [0], [0], [1], [0, 0, 1, 1], [], []>} : vector<8x4xf32>, vector<4x648xf32>, vector<8x648xf32> -> vector<8x648xf32>
    %46 = arith.addf %41, %45 : vector<8x648xf32>
    %c0_44 = arith.constant 0 : index
    %c0_45 = arith.constant 0 : index
    %47 = vector.load %arg2[%c0_44, %c0_45] : memref<8x1xf32, #tpu.memory_space<vmem>>, vector<8x1xf32>
    %48 = vector.broadcast %47 : vector<8x1xf32> to vector<8x648xf32>
    %49 = arith.addf %46, %48 : vector<8x648xf32>
    %cst_46 = arith.constant 0.000000e+00 : f32
    %50 = vector.broadcast %cst_46 : f32 to vector<8x648xf32>
    %51 = arith.maximumf %49, %50 : vector<8x648xf32>
    %c0_47 = arith.constant 0 : index
    %c0_48 = arith.constant 0 : index
    %52 = vector.load %arg11[%c0_47, %c0_48] : memref<8x648xf32, #tpu.memory_space<vmem>>, vector<8x648xf32>
    tpu.vector_store %arg11[%c0_47, %c0_48], %51 {strides = array<i32>} : memref<8x648xf32, #tpu.memory_space<vmem>>, vector<8x648xf32>,
    %53 = vector.extract_strided_slice %51 {offsets = [0, 0], sizes = [8, 629], strides = [1, 1]} : vector<8x648xf32> to vector<8x629xf32>
    %54 = vector.extract_strided_slice %51 {offsets = [0, 1], sizes = [8, 629], strides = [1, 1]} : vector<8x648xf32> to vector<8x629xf32>
    %55 = arith.maximumf %53, %54 : vector<8x629xf32>
    %56 = vector.extract_strided_slice %51 {offsets = [0, 18], sizes = [8, 629], strides = [1, 1]} : vector<8x648xf32> to vector<8x629xf32>
    %57 = vector.extract_strided_slice %51 {offsets = [0, 19], sizes = [8, 629], strides = [1, 1]} : vector<8x648xf32> to vector<8x629xf32>
    %58 = arith.maximumf %56, %57 : vector<8x629xf32>
    %59 = arith.maximumf %55, %58 : vector<8x629xf32>
    %c0_49 = arith.constant 0 : index
    %c0_50 = arith.constant 0 : index
    %60 = vector.load %arg3[%c0_49, %c0_50] : memref<629x222xf32, #tpu.memory_space<vmem>>, vector<629x222xf32>
    %cst_51 = arith.constant dense<0.000000e+00> : vector<8x222xf32>
    %61 = tpu.matmul %59, %60, %cst_51 {dimension_numbers = #tpu.dot_dimension_numbers<[1], [0], [0], [1], [0, 0, 1, 1], [], []>} : vector<8x629xf32>, vector<629x222xf32>, vector<8x222xf32> -> vector<8x222xf32>
    %cst_52 = arith.constant 0.000000e+00 : f32
    %62 = vector.broadcast %cst_52 : f32 to vector<16x200xf32>
    %c0_53 = arith.constant 0 : index
    %c0_54 = arith.constant 0 : index
    %c0_55 = arith.constant 0 : index
    %c0_56 = arith.constant 0 : index
    %63 = vector.load %arg4[%c0_53, %c0_54, %c0_55, %c0_56] : memref<3x3x16x8xf32, #tpu.memory_space<vmem>>, vector<1x1x16x8xf32>
    %64 = vector.shape_cast %63 : vector<1x1x16x8xf32> to vector<16x8xf32>
    %65 = vector.extract_strided_slice %61 {offsets = [0, 0], sizes = [8, 200], strides = [1, 1]} : vector<8x222xf32> to vector<8x200xf32>
    %cst_57 = arith.constant dense<0.000000e+00> : vector<16x200xf32>
    %66 = tpu.matmul %64, %65, %cst_57 {dimension_numbers = #tpu.dot_dimension_numbers<[1], [0], [0], [1], [0, 0, 1, 1], [], []>} : vector<16x8xf32>, vector<8x200xf32>, vector<16x200xf32> -> vector<16x200xf32>
    %67 = arith.addf %62, %66 : vector<16x200xf32>
    %c0_58 = arith.constant 0 : index
    %c1_59 = arith.constant 1 : index
    %c0_60 = arith.constant 0 : index
    %c0_61 = arith.constant 0 : index
    %68 = vector.load %arg4[%c0_58, %c1_59, %c0_60, %c0_61] : memref<3x3x16x8xf32, #tpu.memory_space<vmem>>, vector<1x1x16x8xf32>
    %69 = vector.shape_cast %68 : vector<1x1x16x8xf32> to vector<16x8xf32>
    %70 = vector.extract_strided_slice %61 {offsets = [0, 1], sizes = [8, 200], strides = [1, 1]} : vector<8x222xf32> to vector<8x200xf32>
    %cst_62 = arith.constant dense<0.000000e+00> : vector<16x200xf32>
    %71 = tpu.matmul %69, %70, %cst_62 {dimension_numbers = #tpu.dot_dimension_numbers<[1], [0], [0], [1], [0, 0, 1, 1], [], []>} : vector<16x8xf32>, vector<8x200xf32>, vector<16x200xf32> -> vector<16x200xf32>
    %72 = arith.addf %67, %71 : vector<16x200xf32>
    %c0_63 = arith.constant 0 : index
    %c2_64 = arith.constant 2 : index
    %c0_65 = arith.constant 0 : index
    %c0_66 = arith.constant 0 : index
    %73 = vector.load %arg4[%c0_63, %c2_64, %c0_65, %c0_66] : memref<3x3x16x8xf32, #tpu.memory_space<vmem>>, vector<1x1x16x8xf32>
    %74 = vector.shape_cast %73 : vector<1x1x16x8xf32> to vector<16x8xf32>
    %75 = vector.extract_strided_slice %61 {offsets = [0, 2], sizes = [8, 200], strides = [1, 1]} : vector<8x222xf32> to vector<8x200xf32>
    %cst_67 = arith.constant dense<0.000000e+00> : vector<16x200xf32>
    %76 = tpu.matmul %74, %75, %cst_67 {dimension_numbers = #tpu.dot_dimension_numbers<[1], [0], [0], [1], [0, 0, 1, 1], [], []>} : vector<16x8xf32>, vector<8x200xf32>, vector<16x200xf32> -> vector<16x200xf32>
    %77 = arith.addf %72, %76 : vector<16x200xf32>
    %c1_68 = arith.constant 1 : index
    %c0_69 = arith.constant 0 : index
    %c0_70 = arith.constant 0 : index
    %c0_71 = arith.constant 0 : index
    %78 = vector.load %arg4[%c1_68, %c0_69, %c0_70, %c0_71] : memref<3x3x16x8xf32, #tpu.memory_space<vmem>>, vector<1x1x16x8xf32>
    %79 = vector.shape_cast %78 : vector<1x1x16x8xf32> to vector<16x8xf32>
    %80 = vector.extract_strided_slice %61 {offsets = [0, 10], sizes = [8, 200], strides = [1, 1]} : vector<8x222xf32> to vector<8x200xf32>
    %cst_72 = arith.constant dense<0.000000e+00> : vector<16x200xf32>
    %81 = tpu.matmul %79, %80, %cst_72 {dimension_numbers = #tpu.dot_dimension_numbers<[1], [0], [0], [1], [0, 0, 1, 1], [], []>} : vector<16x8xf32>, vector<8x200xf32>, vector<16x200xf32> -> vector<16x200xf32>
    %82 = arith.addf %77, %81 : vector<16x200xf32>
    %c1_73 = arith.constant 1 : index
    %c1_74 = arith.constant 1 : index
    %c0_75 = arith.constant 0 : index
    %c0_76 = arith.constant 0 : index
    %83 = vector.load %arg4[%c1_73, %c1_74, %c0_75, %c0_76] : memref<3x3x16x8xf32, #tpu.memory_space<vmem>>, vector<1x1x16x8xf32>
    %84 = vector.shape_cast %83 : vector<1x1x16x8xf32> to vector<16x8xf32>
    %85 = vector.extract_strided_slice %61 {offsets = [0, 11], sizes = [8, 200], strides = [1, 1]} : vector<8x222xf32> to vector<8x200xf32>
    %cst_77 = arith.constant dense<0.000000e+00> : vector<16x200xf32>
    %86 = tpu.matmul %84, %85, %cst_77 {dimension_numbers = #tpu.dot_dimension_numbers<[1], [0], [0], [1], [0, 0, 1, 1], [], []>} : vector<16x8xf32>, vector<8x200xf32>, vector<16x200xf32> -> vector<16x200xf32>
    %87 = arith.addf %82, %86 : vector<16x200xf32>
    %c1_78 = arith.constant 1 : index
    %c2_79 = arith.constant 2 : index
    %c0_80 = arith.constant 0 : index
    %c0_81 = arith.constant 0 : index
    %88 = vector.load %arg4[%c1_78, %c2_79, %c0_80, %c0_81] : memref<3x3x16x8xf32, #tpu.memory_space<vmem>>, vector<1x1x16x8xf32>
    %89 = vector.shape_cast %88 : vector<1x1x16x8xf32> to vector<16x8xf32>
    %90 = vector.extract_strided_slice %61 {offsets = [0, 12], sizes = [8, 200], strides = [1, 1]} : vector<8x222xf32> to vector<8x200xf32>
    %cst_82 = arith.constant dense<0.000000e+00> : vector<16x200xf32>
    %91 = tpu.matmul %89, %90, %cst_82 {dimension_numbers = #tpu.dot_dimension_numbers<[1], [0], [0], [1], [0, 0, 1, 1], [], []>} : vector<16x8xf32>, vector<8x200xf32>, vector<16x200xf32> -> vector<16x200xf32>
    %92 = arith.addf %87, %91 : vector<16x200xf32>
    %c2_83 = arith.constant 2 : index
    %c0_84 = arith.constant 0 : index
    %c0_85 = arith.constant 0 : index
    %c0_86 = arith.constant 0 : index
    %93 = vector.load %arg4[%c2_83, %c0_84, %c0_85, %c0_86] : memref<3x3x16x8xf32, #tpu.memory_space<vmem>>, vector<1x1x16x8xf32>
    %94 = vector.shape_cast %93 : vector<1x1x16x8xf32> to vector<16x8xf32>
    %95 = vector.extract_strided_slice %61 {offsets = [0, 20], sizes = [8, 200], strides = [1, 1]} : vector<8x222xf32> to vector<8x200xf32>
    %cst_87 = arith.constant dense<0.000000e+00> : vector<16x200xf32>
    %96 = tpu.matmul %94, %95, %cst_87 {dimension_numbers = #tpu.dot_dimension_numbers<[1], [0], [0], [1], [0, 0, 1, 1], [], []>} : vector<16x8xf32>, vector<8x200xf32>, vector<16x200xf32> -> vector<16x200xf32>
    %97 = arith.addf %92, %96 : vector<16x200xf32>
    %c2_88 = arith.constant 2 : index
    %c1_89 = arith.constant 1 : index
    %c0_90 = arith.constant 0 : index
    %c0_91 = arith.constant 0 : index
    %98 = vector.load %arg4[%c2_88, %c1_89, %c0_90, %c0_91] : memref<3x3x16x8xf32, #tpu.memory_space<vmem>>, vector<1x1x16x8xf32>
    %99 = vector.shape_cast %98 : vector<1x1x16x8xf32> to vector<16x8xf32>
    %100 = vector.extract_strided_slice %61 {offsets = [0, 21], sizes = [8, 200], strides = [1, 1]} : vector<8x222xf32> to vector<8x200xf32>
    %cst_92 = arith.constant dense<0.000000e+00> : vector<16x200xf32>
    %101 = tpu.matmul %99, %100, %cst_92 {dimension_numbers = #tpu.dot_dimension_numbers<[1], [0], [0], [1], [0, 0, 1, 1], [], []>} : vector<16x8xf32>, vector<8x200xf32>, vector<16x200xf32> -> vector<16x200xf32>
    %102 = arith.addf %97, %101 : vector<16x200xf32>
    %c2_93 = arith.constant 2 : index
    %c2_94 = arith.constant 2 : index
    %c0_95 = arith.constant 0 : index
    %c0_96 = arith.constant 0 : index
    %103 = vector.load %arg4[%c2_93, %c2_94, %c0_95, %c0_96] : memref<3x3x16x8xf32, #tpu.memory_space<vmem>>, vector<1x1x16x8xf32>
    %104 = vector.shape_cast %103 : vector<1x1x16x8xf32> to vector<16x8xf32>
    %105 = vector.extract_strided_slice %61 {offsets = [0, 22], sizes = [8, 200], strides = [1, 1]} : vector<8x222xf32> to vector<8x200xf32>
    %cst_97 = arith.constant dense<0.000000e+00> : vector<16x200xf32>
    %106 = tpu.matmul %104, %105, %cst_97 {dimension_numbers = #tpu.dot_dimension_numbers<[1], [0], [0], [1], [0, 0, 1, 1], [], []>} : vector<16x8xf32>, vector<8x200xf32>, vector<16x200xf32> -> vector<16x200xf32>
    %107 = arith.addf %102, %106 : vector<16x200xf32>
    %c0_98 = arith.constant 0 : index
    %c0_99 = arith.constant 0 : index
    %108 = vector.load %arg5[%c0_98, %c0_99] : memref<16x1xf32, #tpu.memory_space<vmem>>, vector<16x1xf32>
    %109 = vector.broadcast %108 : vector<16x1xf32> to vector<16x200xf32>
    %110 = arith.addf %107, %109 : vector<16x200xf32>
    %cst_100 = arith.constant 0.000000e+00 : f32
    %111 = vector.broadcast %cst_100 : f32 to vector<16x200xf32>
    %112 = arith.maximumf %110, %111 : vector<16x200xf32>
    %113 = vector.extract_strided_slice %112 {offsets = [0, 0], sizes = [16, 189], strides = [1, 1]} : vector<16x200xf32> to vector<16x189xf32>
    %114 = vector.extract_strided_slice %112 {offsets = [0, 1], sizes = [16, 189], strides = [1, 1]} : vector<16x200xf32> to vector<16x189xf32>
    %115 = arith.maximumf %113, %114 : vector<16x189xf32>
    %116 = vector.extract_strided_slice %112 {offsets = [0, 10], sizes = [16, 189], strides = [1, 1]} : vector<16x200xf32> to vector<16x189xf32>
    %117 = vector.extract_strided_slice %112 {offsets = [0, 11], sizes = [16, 189], strides = [1, 1]} : vector<16x200xf32> to vector<16x189xf32>
    %118 = arith.maximumf %116, %117 : vector<16x189xf32>
    %119 = arith.maximumf %115, %118 : vector<16x189xf32>
    %c0_101 = arith.constant 0 : index
    %c0_102 = arith.constant 0 : index
    %120 = vector.load %arg6[%c0_101, %c0_102] : memref<189x32xf32, #tpu.memory_space<vmem>>, vector<189x32xf32>
    %cst_103 = arith.constant dense<0.000000e+00> : vector<16x32xf32>
    %121 = tpu.matmul %119, %120, %cst_103 {dimension_numbers = #tpu.dot_dimension_numbers<[1], [0], [0], [1], [0, 0, 1, 1], [], []>} : vector<16x189xf32>, vector<189x32xf32>, vector<16x32xf32> -> vector<16x32xf32>
    %c0_104 = arith.constant 0 : index
    %c0_105 = arith.constant 0 : index
    %122 = vector.load %arg12[%c0_104, %c0_105] : memref<16x32xf32, #tpu.memory_space<vmem>>, vector<16x32xf32>
    tpu.vector_store %arg12[%c0_104, %c0_105], %121 {strides = array<i32>} : memref<16x32xf32, #tpu.memory_space<vmem>>, vector<16x32xf32>,
    %123 = vector.extract_strided_slice %121 {offsets = [0, 0], sizes = [1, 16], strides = [1, 1]} : vector<16x32xf32> to vector<1x16xf32>
    %c0_106 = arith.constant 0 : index
    %c0_107 = arith.constant 0 : index
    %124 = vector.load %arg15[%c0_106, %c0_107] : memref<2x256xf32, #tpu.memory_space<vmem>>, vector<1x16xf32>
    tpu.vector_store %arg15[%c0_106, %c0_107], %123 {strides = array<i32>} : memref<2x256xf32, #tpu.memory_space<vmem>>, vector<1x16xf32>,
    %125 = vector.extract_strided_slice %121 {offsets = [1, 0], sizes = [1, 16], strides = [1, 1]} : vector<16x32xf32> to vector<1x16xf32>
    %c0_108 = arith.constant 0 : index
    %c16 = arith.constant 16 : index
    %126 = vector.load %arg15[%c0_108, %c16] : memref<2x256xf32, #tpu.memory_space<vmem>>, vector<1x16xf32>
    tpu.vector_store %arg15[%c0_108, %c16], %125 {strides = array<i32>} : memref<2x256xf32, #tpu.memory_space<vmem>>, vector<1x16xf32>,
    %127 = vector.extract_strided_slice %121 {offsets = [2, 0], sizes = [1, 16], strides = [1, 1]} : vector<16x32xf32> to vector<1x16xf32>
    %c0_109 = arith.constant 0 : index
    %c32 = arith.constant 32 : index
    %128 = vector.load %arg15[%c0_109, %c32] : memref<2x256xf32, #tpu.memory_space<vmem>>, vector<1x16xf32>
    tpu.vector_store %arg15[%c0_109, %c32], %127 {strides = array<i32>} : memref<2x256xf32, #tpu.memory_space<vmem>>, vector<1x16xf32>,
    %129 = vector.extract_strided_slice %121 {offsets = [3, 0], sizes = [1, 16], strides = [1, 1]} : vector<16x32xf32> to vector<1x16xf32>
    %c0_110 = arith.constant 0 : index
    %c48 = arith.constant 48 : index
    %130 = vector.load %arg15[%c0_110, %c48] : memref<2x256xf32, #tpu.memory_space<vmem>>, vector<1x16xf32>
    tpu.vector_store %arg15[%c0_110, %c48], %129 {strides = array<i32>} : memref<2x256xf32, #tpu.memory_space<vmem>>, vector<1x16xf32>,
    %131 = vector.extract_strided_slice %121 {offsets = [4, 0], sizes = [1, 16], strides = [1, 1]} : vector<16x32xf32> to vector<1x16xf32>
    %c0_111 = arith.constant 0 : index
    %c64 = arith.constant 64 : index
    %132 = vector.load %arg15[%c0_111, %c64] : memref<2x256xf32, #tpu.memory_space<vmem>>, vector<1x16xf32>
    tpu.vector_store %arg15[%c0_111, %c64], %131 {strides = array<i32>} : memref<2x256xf32, #tpu.memory_space<vmem>>, vector<1x16xf32>,
    %133 = vector.extract_strided_slice %121 {offsets = [5, 0], sizes = [1, 16], strides = [1, 1]} : vector<16x32xf32> to vector<1x16xf32>
    %c0_112 = arith.constant 0 : index
    %c80 = arith.constant 80 : index
    %134 = vector.load %arg15[%c0_112, %c80] : memref<2x256xf32, #tpu.memory_space<vmem>>, vector<1x16xf32>
    tpu.vector_store %arg15[%c0_112, %c80], %133 {strides = array<i32>} : memref<2x256xf32, #tpu.memory_space<vmem>>, vector<1x16xf32>,
    %135 = vector.extract_strided_slice %121 {offsets = [6, 0], sizes = [1, 16], strides = [1, 1]} : vector<16x32xf32> to vector<1x16xf32>
    %c0_113 = arith.constant 0 : index
    %c96 = arith.constant 96 : index
    %136 = vector.load %arg15[%c0_113, %c96] : memref<2x256xf32, #tpu.memory_space<vmem>>, vector<1x16xf32>
    tpu.vector_store %arg15[%c0_113, %c96], %135 {strides = array<i32>} : memref<2x256xf32, #tpu.memory_space<vmem>>, vector<1x16xf32>,
    %137 = vector.extract_strided_slice %121 {offsets = [7, 0], sizes = [1, 16], strides = [1, 1]} : vector<16x32xf32> to vector<1x16xf32>
    %c0_114 = arith.constant 0 : index
    %c112 = arith.constant 112 : index
    %138 = vector.load %arg15[%c0_114, %c112] : memref<2x256xf32, #tpu.memory_space<vmem>>, vector<1x16xf32>
    tpu.vector_store %arg15[%c0_114, %c112], %137 {strides = array<i32>} : memref<2x256xf32, #tpu.memory_space<vmem>>, vector<1x16xf32>,
    %139 = vector.extract_strided_slice %121 {offsets = [8, 0], sizes = [1, 16], strides = [1, 1]} : vector<16x32xf32> to vector<1x16xf32>
    %c0_115 = arith.constant 0 : index
    %c128 = arith.constant 128 : index
    %140 = vector.load %arg15[%c0_115, %c128] : memref<2x256xf32, #tpu.memory_space<vmem>>, vector<1x16xf32>
    tpu.vector_store %arg15[%c0_115, %c128], %139 {strides = array<i32>} : memref<2x256xf32, #tpu.memory_space<vmem>>, vector<1x16xf32>,
    %141 = vector.extract_strided_slice %121 {offsets = [9, 0], sizes = [1, 16], strides = [1, 1]} : vector<16x32xf32> to vector<1x16xf32>
    %c0_116 = arith.constant 0 : index
    %c144 = arith.constant 144 : index
    %142 = vector.load %arg15[%c0_116, %c144] : memref<2x256xf32, #tpu.memory_space<vmem>>, vector<1x16xf32>
    tpu.vector_store %arg15[%c0_116, %c144], %141 {strides = array<i32>} : memref<2x256xf32, #tpu.memory_space<vmem>>, vector<1x16xf32>,
    %143 = vector.extract_strided_slice %121 {offsets = [10, 0], sizes = [1, 16], strides = [1, 1]} : vector<16x32xf32> to vector<1x16xf32>
    %c0_117 = arith.constant 0 : index
    %c160 = arith.constant 160 : index
    %144 = vector.load %arg15[%c0_117, %c160] : memref<2x256xf32, #tpu.memory_space<vmem>>, vector<1x16xf32>
    tpu.vector_store %arg15[%c0_117, %c160], %143 {strides = array<i32>} : memref<2x256xf32, #tpu.memory_space<vmem>>, vector<1x16xf32>,
    %145 = vector.extract_strided_slice %121 {offsets = [11, 0], sizes = [1, 16], strides = [1, 1]} : vector<16x32xf32> to vector<1x16xf32>
    %c0_118 = arith.constant 0 : index
    %c176 = arith.constant 176 : index
    %146 = vector.load %arg15[%c0_118, %c176] : memref<2x256xf32, #tpu.memory_space<vmem>>, vector<1x16xf32>
    tpu.vector_store %arg15[%c0_118, %c176], %145 {strides = array<i32>} : memref<2x256xf32, #tpu.memory_space<vmem>>, vector<1x16xf32>,
    %147 = vector.extract_strided_slice %121 {offsets = [12, 0], sizes = [1, 16], strides = [1, 1]} : vector<16x32xf32> to vector<1x16xf32>
    %c0_119 = arith.constant 0 : index
    %c192 = arith.constant 192 : index
    %148 = vector.load %arg15[%c0_119, %c192] : memref<2x256xf32, #tpu.memory_space<vmem>>, vector<1x16xf32>
    tpu.vector_store %arg15[%c0_119, %c192], %147 {strides = array<i32>} : memref<2x256xf32, #tpu.memory_space<vmem>>, vector<1x16xf32>,
    %149 = vector.extract_strided_slice %121 {offsets = [13, 0], sizes = [1, 16], strides = [1, 1]} : vector<16x32xf32> to vector<1x16xf32>
    %c0_120 = arith.constant 0 : index
    %c208 = arith.constant 208 : index
    %150 = vector.load %arg15[%c0_120, %c208] : memref<2x256xf32, #tpu.memory_space<vmem>>, vector<1x16xf32>
    tpu.vector_store %arg15[%c0_120, %c208], %149 {strides = array<i32>} : memref<2x256xf32, #tpu.memory_space<vmem>>, vector<1x16xf32>,
    %151 = vector.extract_strided_slice %121 {offsets = [14, 0], sizes = [1, 16], strides = [1, 1]} : vector<16x32xf32> to vector<1x16xf32>
    %c0_121 = arith.constant 0 : index
    %c224 = arith.constant 224 : index
    %152 = vector.load %arg15[%c0_121, %c224] : memref<2x256xf32, #tpu.memory_space<vmem>>, vector<1x16xf32>
    tpu.vector_store %arg15[%c0_121, %c224], %151 {strides = array<i32>} : memref<2x256xf32, #tpu.memory_space<vmem>>, vector<1x16xf32>,
    %153 = vector.extract_strided_slice %121 {offsets = [15, 0], sizes = [1, 16], strides = [1, 1]} : vector<16x32xf32> to vector<1x16xf32>
    %c0_122 = arith.constant 0 : index
    %c240 = arith.constant 240 : index
    %154 = vector.load %arg15[%c0_122, %c240] : memref<2x256xf32, #tpu.memory_space<vmem>>, vector<1x16xf32>
    tpu.vector_store %arg15[%c0_122, %c240], %153 {strides = array<i32>} : memref<2x256xf32, #tpu.memory_space<vmem>>, vector<1x16xf32>,
    %155 = vector.extract_strided_slice %121 {offsets = [0, 16], sizes = [1, 16], strides = [1, 1]} : vector<16x32xf32> to vector<1x16xf32>
    %c1_123 = arith.constant 1 : index
    %c0_124 = arith.constant 0 : index
    %156 = vector.load %arg15[%c1_123, %c0_124] : memref<2x256xf32, #tpu.memory_space<vmem>>, vector<1x16xf32>
    tpu.vector_store %arg15[%c1_123, %c0_124], %155 {strides = array<i32>} : memref<2x256xf32, #tpu.memory_space<vmem>>, vector<1x16xf32>,
    %157 = vector.extract_strided_slice %121 {offsets = [1, 16], sizes = [1, 16], strides = [1, 1]} : vector<16x32xf32> to vector<1x16xf32>
    %c1_125 = arith.constant 1 : index
    %c16_126 = arith.constant 16 : index
    %158 = vector.load %arg15[%c1_125, %c16_126] : memref<2x256xf32, #tpu.memory_space<vmem>>, vector<1x16xf32>
    tpu.vector_store %arg15[%c1_125, %c16_126], %157 {strides = array<i32>} : memref<2x256xf32, #tpu.memory_space<vmem>>, vector<1x16xf32>,
    %159 = vector.extract_strided_slice %121 {offsets = [2, 16], sizes = [1, 16], strides = [1, 1]} : vector<16x32xf32> to vector<1x16xf32>
    %c1_127 = arith.constant 1 : index
    %c32_128 = arith.constant 32 : index
    %160 = vector.load %arg15[%c1_127, %c32_128] : memref<2x256xf32, #tpu.memory_space<vmem>>, vector<1x16xf32>
    tpu.vector_store %arg15[%c1_127, %c32_128], %159 {strides = array<i32>} : memref<2x256xf32, #tpu.memory_space<vmem>>, vector<1x16xf32>,
    %161 = vector.extract_strided_slice %121 {offsets = [3, 16], sizes = [1, 16], strides = [1, 1]} : vector<16x32xf32> to vector<1x16xf32>
    %c1_129 = arith.constant 1 : index
    %c48_130 = arith.constant 48 : index
    %162 = vector.load %arg15[%c1_129, %c48_130] : memref<2x256xf32, #tpu.memory_space<vmem>>, vector<1x16xf32>
    tpu.vector_store %arg15[%c1_129, %c48_130], %161 {strides = array<i32>} : memref<2x256xf32, #tpu.memory_space<vmem>>, vector<1x16xf32>,
    %163 = vector.extract_strided_slice %121 {offsets = [4, 16], sizes = [1, 16], strides = [1, 1]} : vector<16x32xf32> to vector<1x16xf32>
    %c1_131 = arith.constant 1 : index
    %c64_132 = arith.constant 64 : index
    %164 = vector.load %arg15[%c1_131, %c64_132] : memref<2x256xf32, #tpu.memory_space<vmem>>, vector<1x16xf32>
    tpu.vector_store %arg15[%c1_131, %c64_132], %163 {strides = array<i32>} : memref<2x256xf32, #tpu.memory_space<vmem>>, vector<1x16xf32>,
    %165 = vector.extract_strided_slice %121 {offsets = [5, 16], sizes = [1, 16], strides = [1, 1]} : vector<16x32xf32> to vector<1x16xf32>
    %c1_133 = arith.constant 1 : index
    %c80_134 = arith.constant 80 : index
    %166 = vector.load %arg15[%c1_133, %c80_134] : memref<2x256xf32, #tpu.memory_space<vmem>>, vector<1x16xf32>
    tpu.vector_store %arg15[%c1_133, %c80_134], %165 {strides = array<i32>} : memref<2x256xf32, #tpu.memory_space<vmem>>, vector<1x16xf32>,
    %167 = vector.extract_strided_slice %121 {offsets = [6, 16], sizes = [1, 16], strides = [1, 1]} : vector<16x32xf32> to vector<1x16xf32>
    %c1_135 = arith.constant 1 : index
    %c96_136 = arith.constant 96 : index
    %168 = vector.load %arg15[%c1_135, %c96_136] : memref<2x256xf32, #tpu.memory_space<vmem>>, vector<1x16xf32>
    tpu.vector_store %arg15[%c1_135, %c96_136], %167 {strides = array<i32>} : memref<2x256xf32, #tpu.memory_space<vmem>>, vector<1x16xf32>,
    %169 = vector.extract_strided_slice %121 {offsets = [7, 16], sizes = [1, 16], strides = [1, 1]} : vector<16x32xf32> to vector<1x16xf32>
    %c1_137 = arith.constant 1 : index
    %c112_138 = arith.constant 112 : index
    %170 = vector.load %arg15[%c1_137, %c112_138] : memref<2x256xf32, #tpu.memory_space<vmem>>, vector<1x16xf32>
    tpu.vector_store %arg15[%c1_137, %c112_138], %169 {strides = array<i32>} : memref<2x256xf32, #tpu.memory_space<vmem>>, vector<1x16xf32>,
    %171 = vector.extract_strided_slice %121 {offsets = [8, 16], sizes = [1, 16], strides = [1, 1]} : vector<16x32xf32> to vector<1x16xf32>
    %c1_139 = arith.constant 1 : index
    %c128_140 = arith.constant 128 : index
    %172 = vector.load %arg15[%c1_139, %c128_140] : memref<2x256xf32, #tpu.memory_space<vmem>>, vector<1x16xf32>
    tpu.vector_store %arg15[%c1_139, %c128_140], %171 {strides = array<i32>} : memref<2x256xf32, #tpu.memory_space<vmem>>, vector<1x16xf32>,
    %173 = vector.extract_strided_slice %121 {offsets = [9, 16], sizes = [1, 16], strides = [1, 1]} : vector<16x32xf32> to vector<1x16xf32>
    %c1_141 = arith.constant 1 : index
    %c144_142 = arith.constant 144 : index
    %174 = vector.load %arg15[%c1_141, %c144_142] : memref<2x256xf32, #tpu.memory_space<vmem>>, vector<1x16xf32>
    tpu.vector_store %arg15[%c1_141, %c144_142], %173 {strides = array<i32>} : memref<2x256xf32, #tpu.memory_space<vmem>>, vector<1x16xf32>,
    %175 = vector.extract_strided_slice %121 {offsets = [10, 16], sizes = [1, 16], strides = [1, 1]} : vector<16x32xf32> to vector<1x16xf32>
    %c1_143 = arith.constant 1 : index
    %c160_144 = arith.constant 160 : index
    %176 = vector.load %arg15[%c1_143, %c160_144] : memref<2x256xf32, #tpu.memory_space<vmem>>, vector<1x16xf32>
    tpu.vector_store %arg15[%c1_143, %c160_144], %175 {strides = array<i32>} : memref<2x256xf32, #tpu.memory_space<vmem>>, vector<1x16xf32>,
    %177 = vector.extract_strided_slice %121 {offsets = [11, 16], sizes = [1, 16], strides = [1, 1]} : vector<16x32xf32> to vector<1x16xf32>
    %c1_145 = arith.constant 1 : index
    %c176_146 = arith.constant 176 : index
    %178 = vector.load %arg15[%c1_145, %c176_146] : memref<2x256xf32, #tpu.memory_space<vmem>>, vector<1x16xf32>
    tpu.vector_store %arg15[%c1_145, %c176_146], %177 {strides = array<i32>} : memref<2x256xf32, #tpu.memory_space<vmem>>, vector<1x16xf32>,
    %179 = vector.extract_strided_slice %121 {offsets = [12, 16], sizes = [1, 16], strides = [1, 1]} : vector<16x32xf32> to vector<1x16xf32>
    %c1_147 = arith.constant 1 : index
    %c192_148 = arith.constant 192 : index
    %180 = vector.load %arg15[%c1_147, %c192_148] : memref<2x256xf32, #tpu.memory_space<vmem>>, vector<1x16xf32>
    tpu.vector_store %arg15[%c1_147, %c192_148], %179 {strides = array<i32>} : memref<2x256xf32, #tpu.memory_space<vmem>>, vector<1x16xf32>,
    %181 = vector.extract_strided_slice %121 {offsets = [13, 16], sizes = [1, 16], strides = [1, 1]} : vector<16x32xf32> to vector<1x16xf32>
    %c1_149 = arith.constant 1 : index
    %c208_150 = arith.constant 208 : index
    %182 = vector.load %arg15[%c1_149, %c208_150] : memref<2x256xf32, #tpu.memory_space<vmem>>, vector<1x16xf32>
    tpu.vector_store %arg15[%c1_149, %c208_150], %181 {strides = array<i32>} : memref<2x256xf32, #tpu.memory_space<vmem>>, vector<1x16xf32>,
    %183 = vector.extract_strided_slice %121 {offsets = [14, 16], sizes = [1, 16], strides = [1, 1]} : vector<16x32xf32> to vector<1x16xf32>
    %c1_151 = arith.constant 1 : index
    %c224_152 = arith.constant 224 : index
    %184 = vector.load %arg15[%c1_151, %c224_152] : memref<2x256xf32, #tpu.memory_space<vmem>>, vector<1x16xf32>
    tpu.vector_store %arg15[%c1_151, %c224_152], %183 {strides = array<i32>} : memref<2x256xf32, #tpu.memory_space<vmem>>, vector<1x16xf32>,
    %185 = vector.extract_strided_slice %121 {offsets = [15, 16], sizes = [1, 16], strides = [1, 1]} : vector<16x32xf32> to vector<1x16xf32>
    %c1_153 = arith.constant 1 : index
    %c240_154 = arith.constant 240 : index
    %186 = vector.load %arg15[%c1_153, %c240_154] : memref<2x256xf32, #tpu.memory_space<vmem>>, vector<1x16xf32>
    tpu.vector_store %arg15[%c1_153, %c240_154], %185 {strides = array<i32>} : memref<2x256xf32, #tpu.memory_space<vmem>>, vector<1x16xf32>,
    %c0_155 = arith.constant 0 : index
    %c0_156 = arith.constant 0 : index
    %187 = vector.load %arg15[%c0_155, %c0_156] : memref<2x256xf32, #tpu.memory_space<vmem>>, vector<2x256xf32>
    %c0_157 = arith.constant 0 : index
    %c0_158 = arith.constant 0 : index
    %188 = vector.load %arg7[%c0_157, %c0_158] : memref<256x32xf32, #tpu.memory_space<vmem>>, vector<256x32xf32>
    %cst_159 = arith.constant dense<0.000000e+00> : vector<2x32xf32>
    %189 = tpu.matmul %187, %188, %cst_159 {dimension_numbers = #tpu.dot_dimension_numbers<[1], [0], [0], [1], [0, 0, 1, 1], [], []>} : vector<2x256xf32>, vector<256x32xf32>, vector<2x32xf32> -> vector<2x32xf32>
    %c0_160 = arith.constant 0 : index
    %c0_161 = arith.constant 0 : index
    %190 = vector.load %arg8[%c0_160, %c0_161] : memref<1x32xf32, #tpu.memory_space<vmem>>, vector<1x32xf32>
    %191 = vector.broadcast %190 : vector<1x32xf32> to vector<2x32xf32>
    %192 = arith.addf %189, %191 : vector<2x32xf32>
    %c0_162 = arith.constant 0 : index
    %c0_163 = arith.constant 0 : index
    %193 = vector.load %arg13[%c0_162, %c0_163] : memref<2x32xf32, #tpu.memory_space<vmem>>, vector<2x32xf32>
    tpu.vector_store %arg13[%c0_162, %c0_163], %192 {strides = array<i32>} : memref<2x32xf32, #tpu.memory_space<vmem>>, vector<2x32xf32>,
    %cst_164 = arith.constant 0.000000e+00 : f32
    %194 = vector.broadcast %cst_164 : f32 to vector<2x32xf32>
    %195 = arith.maximumf %192, %194 : vector<2x32xf32>
    %c0_165 = arith.constant 0 : index
    %c0_166 = arith.constant 0 : index
    %196 = vector.load %arg9[%c0_165, %c0_166] : memref<32x10xf32, #tpu.memory_space<vmem>>, vector<32x10xf32>
    %cst_167 = arith.constant dense<0.000000e+00> : vector<2x10xf32>
    %197 = tpu.matmul %195, %196, %cst_167 {dimension_numbers = #tpu.dot_dimension_numbers<[1], [0], [0], [1], [0, 0, 1, 1], [], []>} : vector<2x32xf32>, vector<32x10xf32>, vector<2x10xf32> -> vector<2x10xf32>
    %c0_168 = arith.constant 0 : index
    %c0_169 = arith.constant 0 : index
    %198 = vector.load %arg10[%c0_168, %c0_169] : memref<1x10xf32, #tpu.memory_space<vmem>>, vector<1x10xf32>
    %199 = vector.broadcast %198 : vector<1x10xf32> to vector<2x10xf32>
    %200 = arith.addf %197, %199 : vector<2x10xf32>
    %c0_170 = arith.constant 0 : index
    %c0_171 = arith.constant 0 : index
    %201 = vector.load %arg14[%c0_170, %c0_171] : memref<2x10xf32, #tpu.memory_space<vmem>>, vector<2x10xf32>
    tpu.vector_store %arg14[%c0_170, %c0_171], %200 {strides = array<i32>} : memref<2x10xf32, #tpu.memory_space<vmem>>, vector<2x10xf32>,
    return
  }
}

</mosaic_0001>

<bundles_post_ra>
// kernel: _fused_forward.1
= control target key start
LH: loop header
LB: loop body
LE: loop exit
PB: predicated region body
PF: predicated region fallthrough
CT: control target
= control target key end

     0   :  { %20 = vsyncpa [#allocation4], 0  ;;  %s4845_s17 = smov 127   ;;  %s6271_s0 = inlined_call_operand.vmem [shape: f32[4,686], index: 0, kind: input, shape index: {}]   ;;  %s6272_s1 = inlined_call_operand.vmem [shape: f32[3,3,8,4], index: 1, kind: input, shape index: {}]   ;;  %s6273_s2 = inlined_call_operand.vmem [shape: f32[8,1], index: 2, kind: input, shape index: {}]   ;;  %s6274_s3 = inlined_call_operand.vmem [shape: f32[629,222], index: 3, kind: input, shape index: {}]   ;;  %s6275_s4 = inlined_call_operand.vmem [shape: f32[3,3,16,8], index: 4, kind: input, shape index: {}]   ;;  %s6276_s5 = inlined_call_operand.vmem [shape: f32[16,1], index: 5, kind: input, shape index: {}]   ;;  %s6277_s6 = inlined_call_operand.vmem [shape: f32[189,32], index: 6, kind: input, shape index: {}]   ;;  %s6278_s7 = inlined_call_operand.vmem [shape: f32[256,32], index: 7, kind: input, shape index: {}]   ;;  %s6279_s8 = inlined_call_operand.vmem [shape: f32[1,32], index: 8, kind: input, shape index: {}]   ;;  %s6280_s9 = inlined_call_operand.vmem [shape: f32[32,10], index: 9, kind: input, shape index: {}]   ;;  %s6281_s10 = inlined_call_operand.vmem [shape: f32[1,10], index: 10, kind: input, shape index: {}]   ;;  %s6282_s11 = inlined_call_operand.vmem [shape: f32[8,648], index: 11, kind: output, shape index: {0}]   ;;  %s6283_s12 = inlined_call_operand.vmem [shape: f32[16,32], index: 12, kind: output, shape index: {1}]   ;;  %s6284_s13 = inlined_call_operand.hbm [shape: f32[2,32], index: 13, kind: output, shape index: {2}]   ;;  %s6285_s14 = inlined_call_operand.hbm [shape: f32[2,10], index: 14, kind: output, shape index: {3}]  }
   0x1   :  { %v4951_v0 = vld [vmem:[%s6271_s0] sm:$0xff]  ;;  %v4956_v1 = vld [vmem:[%s6271_s0 + $0x8] sm:$0xff] }
   0x2   :  { %56 = vrot.lane.b32.xlu1 %v4951_v0, %s4845_s17  ;;  %v4962_v2 = vcombine.high %v4951_v0, %v4951_v0  ;;  %v4966_v3 = vcombine.high %v4956_v1, %v4956_v1 }
   0x3   :  { %21 = vsyncpa [#allocation6], 0  ;;  %v4971_v4 = vld [vmem:[%s6271_s0 + $0x10] sm:$0xff]  ;;  %v4846_v5 = vmov 0.0   ;;  %s4847_s0 = smov 126   ;;  %s4848_s20 = smov 110  }
   0x4   :  { %58 = vrot.lane.b32.xlu0 %v4962_v2, %s4845_s17  ;;  %155 = vmatprep.mubr.f32.mxu1 %v4846_v5  ;;  %v4981_v6 = vcombine.high %v4971_v4, %v4971_v4  ;;  %s4849_s21 = smov 109   ;;  %s4850_s22 = smov 108   ;;  %v4854_v7 = vmov 0   ;;  %v2310_v8 = vld [vmem:[%s6273_s2] sm:$0xff]  ;;  %vm68_vm0 = vcmask 1039360   ;;  %vm78_vm1 = vcmask 1043456  }
   0x5   :  { %297 = vmatprep.mubr.f32.mxu0 %v4846_v5  ;;  %s4851_s23 = smov 92   ;;  %s4852_s24 = smov 91   ;;  %4777 = vset.pattern.permute.xlu0 %v4854_v7  ;;  %v4250_v14 = vld [vmem:[%s6272_s1 + $0x8] sm:$0xff]  ;;  %vm74_vm2 = vcmask 31744   ;;  %v47_v23 = vld [vmem:[%s6272_s1] sm:$0xff]  ;;  %vm546_vm3 = vcmask 1031168  }
   0x6   :  { %62 = vrot.lane.b32.xlu1 %v4966_v3, %s4845_s17  ;;  %s4853_s25 = smov 90   ;;  %v4269_v30 = vld [vmem:[%s6272_s1 + $0x10] sm:$0xff]  ;;  %vm800_vm4 = vcmask 900096   ;;  %v4279_v39 = vld [vmem:[%s6272_s1 + $0x18] sm:$0xff]  ;;  %vm1054_vm5 = vcmask 891904   ;;  %v4289_v51 = vld [vmem:[%s6272_s1 + $0x20] sm:$0xff] }
   0x7   :  { %4793 = vset.pattern.permute.xlu1 %v4854_v7  ;;  %vm1308_vm6 = vcmask 883712   ;;  %v4299_v63 = vld [vmem:[%s6272_s1 + $0x28] sm:$0xff]  ;;  %vm1562_vm7 = vcmask 752640   ;;  %vm1816_vm8 = vcmask 744448   ;;  %vm2070_vm9 = vcmask 736256   ;;  %s4856_s18 = smov 117  }
   0x8   :  { %60 = vrot.lane.b32.xlu0 %v4956_v1, %s4845_s17  ;;  %vm2333_vm10 = vcmask 64512   ;;  %vm2567_vm11 = vcmask 1044480   ;;  %vm2563_vm12 = vcmask 957440   ;;  %s4859_s19 = smov 106   ;;  %vm3071_vm13 = vcmask 965632   ;;  %s4871_s15 = smov [#allocation3]  }
   0x9   :  { %vm3266_vm14 = vcmask 949248   ;;  %vm3461_vm15 = vcmask 875520  }
   0xa   :  { %66 = vrot.lane.b32.xlu1 %v4981_v6, %s4845_s17 }
   0xc   :  { %64 = vrot.lane.b32.xlu0 %v4971_v4, %s4845_s17 }
   0xe   :  { %538 = vrot.lane.b32.xlu1 %v4956_v1, %s4847_s0 }
  0x10   :  { %536 = vrot.lane.b32.xlu0 %v4962_v2, %s4847_s0 }
  0x12   :  { %540 = vrot.lane.b32.xlu1 %v4966_v3, %s4847_s0 }
  0x14   :  { %534 = vrot.lane.b32.xlu0 %v4951_v0, %s4847_s0 }
  0x16   :  { %544 = vrot.lane.b32.xlu1 %v4981_v6, %s4847_s0 }
  0x18   :  { %542 = vrot.lane.b32.xlu0 %v4971_v4, %s4847_s0 }
  0x1a   :  { %792 = vrot.lane.b32.xlu1 %v4956_v1, %s4848_s20 }
  0x1c   :  { %790 = vrot.lane.b32.xlu0 %v4962_v2, %s4848_s20 }
  0x1e   :  { %794 = vrot.lane.b32.xlu1 %v4966_v3, %s4848_s20 }
  0x20   :  { %788 = vrot.lane.b32.xlu0 %v4951_v0, %s4848_s20 }
  0x22   :  { %798 = vrot.lane.b32.xlu1 %v4981_v6, %s4848_s20 }
  0x24   :  { %796 = vrot.lane.b32.xlu0 %v4971_v4, %s4848_s20 }
  0x26   :  { %1046 = vrot.lane.b32.xlu1 %v4956_v1, %s4849_s21 }
  0x28   :  { %1044 = vrot.lane.b32.xlu0 %v4962_v2, %s4849_s21 }
  0x2a   :  { %1048 = vrot.lane.b32.xlu1 %v4966_v3, %s4849_s21 }
  0x2c   :  { %1042 = vrot.lane.b32.xlu0 %v4951_v0, %s4849_s21 }
  0x2e   :  { %1052 = vrot.lane.b32.xlu1 %v4981_v6, %s4849_s21 }
  0x30   :  { %1050 = vrot.lane.b32.xlu0 %v4971_v4, %s4849_s21 }
  0x32   :  { %1300 = vrot.lane.b32.xlu1 %v4956_v1, %s4850_s22 }
  0x34   :  { %1298 = vrot.lane.b32.xlu0 %v4962_v2, %s4850_s22 }
  0x36   :  { %1302 = vrot.lane.b32.xlu1 %v4966_v3, %s4850_s22 }
  0x38   :  { %1296 = vrot.lane.b32.xlu0 %v4951_v0, %s4850_s22 }
  0x3a   :  { %1306 = vrot.lane.b32.xlu1 %v4981_v6, %s4850_s22 }
  0x3c   :  { %1304 = vrot.lane.b32.xlu0 %v4971_v4, %s4850_s22 }
  0x3e   :  { %1554 = vrot.lane.b32.xlu1 %v4956_v1, %s4851_s23 }
  0x40   :  { %1552 = vrot.lane.b32.xlu0 %v4962_v2, %s4851_s23 }
  0x42   :  { %1556 = vrot.lane.b32.xlu1 %v4966_v3, %s4851_s23 }
  0x44   :  { %1550 = vrot.lane.b32.xlu0 %v4951_v0, %s4851_s23 }
  0x46   :  { %1560 = vrot.lane.b32.xlu1 %v4981_v6, %s4851_s23 }
  0x48   :  { %1558 = vrot.lane.b32.xlu0 %v4971_v4, %s4851_s23 }
  0x4a   :  { %1808 = vrot.lane.b32.xlu1 %v4956_v1, %s4852_s24 }
  0x4c   :  { %1806 = vrot.lane.b32.xlu0 %v4962_v2, %s4852_s24 }
  0x4e   :  { %1810 = vrot.lane.b32.xlu1 %v4966_v3, %s4852_s24 }
  0x50   :  { %1804 = vrot.lane.b32.xlu0 %v4951_v0, %s4852_s24 }
  0x52   :  { %1814 = vrot.lane.b32.xlu1 %v4981_v6, %s4852_s24 }
  0x54   :  { %1812 = vrot.lane.b32.xlu0 %v4971_v4, %s4852_s24  ;;  %s4864_s24 = smov 32  }
  0x56   :  { %2062 = vrot.lane.b32.xlu1 %v4956_v1, %s4853_s25 }
  0x58   :  { %2060 = vrot.lane.b32.xlu0 %v4962_v2, %s4853_s25 }
  0x5a   :  { %2064 = vrot.lane.b32.xlu1 %v4966_v3, %s4853_s25 }
  0x5c   :  { %2058 = vrot.lane.b32.xlu0 %v4951_v0, %s4853_s25 }
  0x5e   :  { %2068 = vrot.lane.b32.xlu1 %v4981_v6, %s4853_s25 }
  0x60   :  { %2066 = vrot.lane.b32.xlu0 %v4971_v4, %s4853_s25  ;;  %s4865_s25 = smov 16  }
  0x64   :  { %2313 = vperm.xlu0 %4777, %v2310_v8  }
  0x74   :  { %v57_v9 = vpop.permute.xlu1 %56 }
  0x76   :  { %v59_v10 = vpop.permute.xlu0 %58 }
  0x77   :  { %v69_v15 = vsel %vm68_vm0, %v57_v9, %v59_v10 }
  0x78   :  { %v63_v11 = vpop.permute.xlu1 %62 }
  0x7a   :  { %v61_v12 = vpop.permute.xlu0 %60 }
  0x7b   :  { %v70_v13 = vsel %vm68_vm0, %v59_v10, %v61_v12  ;;  %v71_v20 = vsel %vm68_vm0, %v61_v12, %v63_v11  ;;  %v4309_v12 = vld [vmem:[%s6272_s1 + $0x30] sm:$0xff] }
  0x7c   :  { %4251 = vmatprep.subr.msk.mxu1 %vm78_vm1, %v70_v13  ;;  %v67_v16 = vpop.permute.xlu1 %66 }
  0x7d   :  { %4252 = vmatpush1.msk.msra.mxu1 %vm78_vm1, %v69_v15  ;;  %4257 = vmatprep.subr.msk.mxu0 %vm78_vm1, %v67_v16 }
  0x7e   :  { %v65_v17 = vpop.permute.xlu0 %64  ;;  %4253 = vmatmul.mubr.msk.f32.vlgmr.msra.gmra.mrb[0].mxu1 %vm74_vm2, %v4250_v14 }
  0x7f   :  { %v72_v18 = vsel %vm68_vm0, %v63_v11, %v65_v17  ;;  %v73_v19 = vsel %vm68_vm0, %v65_v17, %v67_v16  ;;  %226 = vmatprep.mubr.f32.mxu1 %v4846_v5 }
  0x80   :  { %4254 = vmatprep.subr.msk.mxu1 %vm78_vm1, %v72_v18  ;;  %4258 = vmatpush1.msk.msra.mxu0 %vm78_vm1, %v73_v19  ;;  %v539_v21 = vpop.permute.xlu1 %538 }
  0x81   :  { %4255 = vmatpush1.msk.msra.mxu1 %vm78_vm1, %v71_v20  ;;  %4259 = vmatmul.mubr.msk.f32.vlgmr.msra.gmra.mrb[0].mxu0 %vm74_vm2, %v4250_v14 }
  0x82   :  { %4260 = vmatprep.subr.msk.mxu0 %vm78_vm1, %v4962_v2  ;;  %v537_v22 = vpop.permute.xlu0 %536  ;;  %383 = vmatprep.mubr.f32.mxu0 %v4846_v5 }
  0x83   :  { %4261 = vmatpush1.msk.msra.mxu0 %vm78_vm1, %v4951_v0  ;;  %4256 = vmatmul.mubr.msk.f32.vlgmr.msra.gmra.mrb[2].mxu1 %vm74_vm2, %v4250_v14  ;;  %v548_v25 = vsel %vm546_vm3, %v537_v22, %v539_v21 }
  0x84   :  { %4266 = vmatprep.subr.msk.mxu0 %vm78_vm1, %v4981_v6  ;;  %v541_v24 = vpop.permute.xlu1 %540  ;;  %4263 = vmatprep.subr.msk.mxu1 %vm78_vm1, %v4966_v3 }
  0x85   :  { %4262 = vmatmul.mubr.msk.f32.vlgmr.msra.gmra.mrb[2].mxu0 %vm74_vm2, %v47_v23  ;;  %4264 = vmatpush1.msk.msra.mxu1 %vm78_vm1, %v4956_v1  ;;  %v549_v33 = vsel %vm546_vm3, %v539_v21, %v541_v24 }
  0x86   :  { %4267 = vmatpush1.msk.msra.mxu0 %vm78_vm1, %v4971_v4  ;;  %v535_v26 = vpop.permute.xlu0 %534  ;;  %525 = vmatprep.mubr.f32.mxu0 %v4846_v5 }
  0x87   :  { %4270 = vmatprep.subr.msk.mxu0 %vm78_vm1, %v548_v25  ;;  %v547_v27 = vsel %vm546_vm3, %v535_v26, %v537_v22  ;;  %454 = vmatprep.mubr.f32.mxu1 %v4846_v5 }
  0x88   :  { %v545_v28 = vpop.permute.xlu1 %544 }
  0x89   :  { %4268 = vmatmul.mubr.msk.f32.vlgmr.msra.gmra.mrb[0].mxu0 %vm74_vm2, %v47_v23 }
  0x8a   :  { %4271 = vmatpush1.msk.msra.mxu0 %vm78_vm1, %v547_v27  ;;  %v543_v29 = vpop.permute.xlu0 %542  ;;  %631 = vmatprep.mubr.f32.mxu0 %v4846_v5 }
  0x8b   :  { %v551_v31 = vsel %vm546_vm3, %v543_v29, %v545_v28  ;;  %v550_v32 = vsel %vm546_vm3, %v541_v24, %v543_v29  ;;  %4276 = vmatprep.subr.msk.mxu0 %vm78_vm1, %v545_v28  ;;  %4265 = vmatmul.mubr.msk.f32.vlgmr.msra.gmra.mrb[2].mxu1 %vm74_vm2, %v47_v23  ;;  %v4319_v24 = vld [vmem:[%s6272_s1 + $0x38] sm:$0xff] }
  0x8c   :  { %4273 = vmatprep.subr.msk.mxu1 %vm78_vm1, %v550_v32  ;;  %v793_v34 = vpop.permute.xlu1 %792  ;;  %702 = vmatprep.mubr.f32.mxu1 %v4846_v5 }
  0x8d   :  { %4272 = vmatmul.mubr.msk.f32.vlgmr.msra.gmra.mrb[2].mxu0 %vm74_vm2, %v4269_v30  ;;  %4274 = vmatpush1.msk.msra.mxu1 %vm78_vm1, %v549_v33 }
  0x8e   :  { %4277 = vmatpush1.msk.msra.mxu0 %vm78_vm1, %v551_v31  ;;  %v791_v35 = vpop.permute.xlu0 %790  ;;  %773 = vmatprep.mubr.f32.mxu0 %v4846_v5 }
  0x8f   :  { %v802_v36 = vsel %vm800_vm4, %v791_v35, %v793_v34 }
  0x90   :  { %4280 = vmatprep.subr.msk.mxu0 %vm78_vm1, %v802_v36  ;;  %v795_v37 = vpop.permute.xlu1 %794  ;;  %v4329_v36 = vld [vmem:[%s6272_s1 + $0x40] sm:$0xff] }
  0x91   :  { %4278 = vmatmul.mubr.msk.f32.vlgmr.msra.gmra.mrb[0].mxu0 %vm74_vm2, %v4269_v30  ;;  %v803_v45 = vsel %vm800_vm4, %v793_v34, %v795_v37 }
  0x92   :  { %v789_v38 = vpop.permute.xlu0 %788  ;;  %885 = vmatprep.mubr.f32.mxu0 %v4846_v5 }
  0x93   :  { %v801_v40 = vsel %vm800_vm4, %v789_v38, %v791_v35  ;;  %4275 = vmatmul.mubr.msk.f32.vlgmr.msra.gmra.mrb[2].mxu1 %vm74_vm2, %v4269_v30 }
  0x94   :  { %4281 = vmatpush1.msk.msra.mxu0 %vm78_vm1, %v801_v40  ;;  %v799_v41 = vpop.permute.xlu1 %798  ;;  %956 = vmatprep.mubr.f32.mxu1 %v4846_v5 }
  0x95   :  { %4286 = vmatprep.subr.msk.mxu0 %vm78_vm1, %v799_v41  ;;  %4282 = vmatmul.mubr.msk.f32.vlgmr.msra.gmra.mrb[2].mxu0 %vm74_vm2, %v4279_v39 }
  0x96   :  { %v797_v42 = vpop.permute.xlu0 %796  ;;  %1027 = vmatprep.mubr.f32.mxu0 %v4846_v5 }
  0x97   :  { %v804_v43 = vsel %vm800_vm4, %v795_v37, %v797_v42  ;;  %v805_v44 = vsel %vm800_vm4, %v797_v42, %v799_v41 }
  0x98   :  { %4283 = vmatprep.subr.msk.mxu1 %vm78_vm1, %v804_v43  ;;  %4287 = vmatpush1.msk.msra.mxu0 %vm78_vm1, %v805_v44  ;;  %v1047_v46 = vpop.permute.xlu1 %1046 }
  0x99   :  { %4284 = vmatpush1.msk.msra.mxu1 %vm78_vm1, %v803_v45  ;;  %4288 = vmatmul.mubr.msk.f32.vlgmr.msra.gmra.mrb[0].mxu0 %vm74_vm2, %v4279_v39 }
  0x9a   :  { %v1045_v47 = vpop.permute.xlu0 %1044  ;;  %1139 = vmatprep.mubr.f32.mxu0 %v4846_v5 }
  0x9b   :  { %v1056_v48 = vsel %vm1054_vm5, %v1045_v47, %v1047_v46  ;;  %4285 = vmatmul.mubr.msk.f32.vlgmr.msra.gmra.mrb[2].mxu1 %vm74_vm2, %v4279_v39 }
  0x9c   :  { %4290 = vmatprep.subr.msk.mxu0 %vm78_vm1, %v1056_v48  ;;  %v1049_v49 = vpop.permute.xlu1 %1048  ;;  %1210 = vmatprep.mubr.f32.mxu1 %v4846_v5 }
  0x9d   :  { %v1057_v57 = vsel %vm1054_vm5, %v1047_v46, %v1049_v49 }
  0x9e   :  { %v1043_v50 = vpop.permute.xlu0 %1042 }
  0x9f   :  { %v1055_v52 = vsel %vm1054_vm5, %v1043_v50, %v1045_v47 }
  0xa0   :  { %4291 = vmatpush1.msk.msra.mxu0 %vm78_vm1, %v1055_v52  ;;  %v1053_v53 = vpop.permute.xlu1 %1052 }
  0xa1   :  { %4296 = vmatprep.subr.msk.mxu0 %vm78_vm1, %v1053_v53  ;;  %4292 = vmatmul.mubr.msk.f32.vlgmr.msra.gmra.mrb[2].mxu0 %vm74_vm2, %v4289_v51 }
  0xa2   :  { %v1051_v54 = vpop.permute.xlu0 %1050  ;;  %1281 = vmatprep.mubr.f32.mxu0 %v4846_v5 }
  0xa3   :  { %v1058_v55 = vsel %vm1054_vm5, %v1049_v49, %v1051_v54  ;;  %v1059_v56 = vsel %vm1054_vm5, %v1051_v54, %v1053_v53  ;;  %vm3826_vm5 = vcmask 122880  }
  0xa4   :  { %4293 = vmatprep.subr.msk.mxu1 %vm78_vm1, %v1058_v55  ;;  %4297 = vmatpush1.msk.msra.mxu0 %vm78_vm1, %v1059_v56  ;;  %v1301_v58 = vpop.permute.xlu1 %1300 }
  0xa5   :  { %4294 = vmatpush1.msk.msra.mxu1 %vm78_vm1, %v1057_v57  ;;  %4298 = vmatmul.mubr.msk.f32.vlgmr.msra.gmra.mrb[0].mxu0 %vm74_vm2, %v4289_v51 }
  0xa6   :  { %v1299_v59 = vpop.permute.xlu0 %1298  ;;  %1393 = vmatprep.mubr.f32.mxu0 %v4846_v5  ;;  %4295 = vmatmul.mubr.msk.f32.vlgmr.msra.gmra.mrb[2].mxu1 %vm74_vm2, %v4289_v51 }
  0xa7   :  { %v1310_v60 = vsel %vm1308_vm6, %v1299_v59, %v1301_v58  ;;  %1464 = vmatprep.mubr.f32.mxu1 %v4846_v5 }
  0xa8   :  { %4300 = vmatprep.subr.msk.mxu0 %vm78_vm1, %v1310_v60  ;;  %v1303_v61 = vpop.permute.xlu1 %1302 }
  0xa9   :  { %v1311_v6 = vsel %vm1308_vm6, %v1301_v58, %v1303_v61 }
  0xaa   :  { %v1297_v62 = vpop.permute.xlu0 %1296 }
  0xab   :  { %v1309_v0 = vsel %vm1308_vm6, %v1297_v62, %v1299_v59 }
  0xac   :  { %4301 = vmatpush1.msk.msra.mxu0 %vm78_vm1, %v1309_v0  ;;  %v1307_v1 = vpop.permute.xlu1 %1306 }
  0xad   :  { %4306 = vmatprep.subr.msk.mxu0 %vm78_vm1, %v1307_v1  ;;  %4302 = vmatmul.mubr.msk.f32.vlgmr.msra.gmra.mrb[2].mxu0 %vm74_vm2, %v4299_v63 }
  0xae   :  { %v1305_v2 = vpop.permute.xlu0 %1304  ;;  %1535 = vmatprep.mubr.f32.mxu0 %v4846_v5 }
  0xaf   :  { %v1312_v3 = vsel %vm1308_vm6, %v1303_v61, %v1305_v2  ;;  %v1313_v4 = vsel %vm1308_vm6, %v1305_v2, %v1307_v1 }
  0xb0   :  { %4303 = vmatprep.subr.msk.mxu1 %vm78_vm1, %v1312_v3  ;;  %4307 = vmatpush1.msk.msra.mxu0 %vm78_vm1, %v1313_v4  ;;  %v1555_v7 = vpop.permute.xlu1 %1554  ;;  %v2406_v4 = vld [vmem:[%s6274_s3 + $0x8] sm:$0xff] }
  0xb1   :  { %4304 = vmatpush1.msk.msra.mxu1 %vm78_vm1, %v1311_v6  ;;  %4308 = vmatmul.mubr.msk.f32.vlgmr.msra.gmra.mrb[0].mxu0 %vm74_vm2, %v4299_v63  ;;  %v2408_v6 = vld [vmem:[%s6274_s3 + $0x18] sm:$0xff] }
  0xb2   :  { %v1553_v8 = vpop.permute.xlu0 %1552  ;;  %1647 = vmatprep.mubr.f32.mxu0 %v4846_v5  ;;  %4305 = vmatmul.mubr.msk.f32.vlgmr.msra.gmra.mrb[2].mxu1 %vm74_vm2, %v4299_v63 }
  0xb3   :  { %v1564_v9 = vsel %vm1562_vm7, %v1553_v8, %v1555_v7  ;;  %1718 = vmatprep.mubr.f32.mxu1 %v4846_v5 }
  0xb4   :  { %4310 = vmatprep.subr.msk.mxu0 %vm78_vm1, %v1564_v9  ;;  %v1557_v10 = vpop.permute.xlu1 %1556  ;;  %v2407_v9 = vld [vmem:[%s6274_s3 + $0x10] sm:$0xff] }
  0xb5   :  { %v1565_v18 = vsel %vm1562_vm7, %v1555_v7, %v1557_v10  ;;  %v2405_v7 = vld [vmem:[%s6274_s3] sm:$0xff] }
  0xb6   :  { %v1551_v11 = vpop.permute.xlu0 %1550 }
  0xb7   :  { %v1563_v13 = vsel %vm1562_vm7, %v1551_v11, %v1553_v8  ;;  %v4434_v8 = vpack.c.bf16 %v2408_v6, %v2406_v4  ;;  %v2412_v11 = vld [vmem:[%s6274_s3 + $0x38] sm:$0xff]  ;;  %v2441_v4 = vld [vmem:[%s6274_s3 + $0x120] sm:$0xff]  ;;  %v2443_v6 = vld [vmem:[%s6274_s3 + $0x130] sm:$0xff] }
  0xb8   :  { %4311 = vmatpush1.msk.msra.mxu0 %vm78_vm1, %v1563_v13  ;;  %v1561_v14 = vpop.permute.xlu1 %1560 }
  0xb9   :  { %4316 = vmatprep.subr.msk.mxu0 %vm78_vm1, %v1561_v14  ;;  %4312 = vmatmul.mubr.msk.f32.vlgmr.msra.gmra.mrb[2].mxu0 %vm74_vm2, %v4309_v12 }
  0xba   :  { %v1559_v15 = vpop.permute.xlu0 %1558  ;;  %1789 = vmatprep.mubr.f32.mxu0 %v4846_v5 }
  0xbb   :  { %v1566_v16 = vsel %vm1562_vm7, %v1557_v10, %v1559_v15  ;;  %v1567_v17 = vsel %vm1562_vm7, %v1559_v15, %v1561_v14  ;;  %v2410_v10 = vld [vmem:[%s6274_s3 + $0x28] sm:$0xff]  ;;  %v2409_v14 = vld [vmem:[%s6274_s3 + $0x20] sm:$0xff]  ;;  %v2411_v15 = vld [vmem:[%s6274_s3 + $0x30] sm:$0xff]  ;;  %vm3847_vm7 = vcmask 385280  }
  0xbc   :  { %4313 = vmatprep.subr.msk.mxu1 %vm78_vm1, %v1566_v16  ;;  %4317 = vmatpush1.msk.msra.mxu0 %vm78_vm1, %v1567_v17  ;;  %v1809_v19 = vpop.permute.xlu1 %1808  ;;  %v4438_v13 = vpack.c.bf16 %v2412_v11, %v2410_v10  ;;  %v2414_v16 = vld [vmem:[%s6274_s3 + $0x48] sm:$0xff]  ;;  %v2416_v17 = vld [vmem:[%s6274_s3 + $0x58] sm:$0xff]  ;;  %v2445_v11 = vld [vmem:[%s6274_s3 + $0x140] sm:$0xff] }
  0xbd   :  { %4314 = vmatpush1.msk.msra.mxu1 %vm78_vm1, %v1565_v18  ;;  %4318 = vmatmul.mubr.msk.f32.vlgmr.msra.gmra.mrb[0].mxu0 %vm74_vm2, %v4309_v12  ;;  %v4440_v18 = vpack.c.bf16 %v2411_v15, %v2409_v14  ;;  %v2452_v14 = vld [vmem:[%s6274_s3 + $0x178] sm:$0xff] }
  0xbe   :  { %v1807_v20 = vpop.permute.xlu0 %1806  ;;  %4315 = vmatmul.mubr.msk.f32.vlgmr.msra.gmra.mrb[2].mxu1 %vm74_vm2, %v4309_v12  ;;  %1901 = vmatprep.mubr.f32.mxu0 %v4846_v5  ;;  %v4436_v12 = vpack.c.bf16 %v2407_v9, %v2405_v7  ;;  %v2446_v7 = vld [vmem:[%s6274_s3 + $0x148] sm:$0xff]  ;;  %v4472_v9 = vpack.c.bf16 %v2443_v6, %v2441_v4  ;;  %v2471_v4 = vld [vmem:[%s6274_s3 + $0x210] sm:$0xff] }
  0xbf   :  { %v1818_v21 = vsel %vm1816_vm8, %v1807_v20, %v1809_v19  ;;  %1972 = vmatprep.mubr.f32.mxu1 %v4846_v5 }
  0xc0   :  { %4320 = vmatprep.subr.msk.mxu0 %vm78_vm1, %v1818_v21  ;;  %v1811_v22 = vpop.permute.xlu1 %1810  ;;  %v2415_v21 = vld [vmem:[%s6274_s3 + $0x50] sm:$0xff] }
  0xc1   :  { %v1819_v30 = vsel %vm1816_vm8, %v1809_v19, %v1811_v22  ;;  %v4442_v19 = vpack.c.bf16 %v2416_v17, %v2414_v16  ;;  %v2449_v17 = vld [vmem:[%s6274_s3 + $0x160] sm:$0xff] }
  0xc2   :  { %v1805_v23 = vpop.permute.xlu0 %1804 }
  0xc3   :  { %v1817_v25 = vsel %vm1816_vm8, %v1805_v23, %v1807_v20  ;;  %v2413_v20 = vld [vmem:[%s6274_s3 + $0x40] sm:$0xff]  ;;  %v2420_v23 = vld [vmem:[%s6274_s3 + $0x78] sm:$0xff] }
  0xc4   :  { %4321 = vmatpush1.msk.msra.mxu0 %vm78_vm1, %v1817_v25  ;;  %v1815_v26 = vpop.permute.xlu1 %1814 }
  0xc5   :  { %4326 = vmatprep.subr.msk.mxu0 %vm78_vm1, %v1815_v26  ;;  %4322 = vmatmul.mubr.msk.f32.vlgmr.msra.gmra.mrb[2].mxu0 %vm74_vm2, %v4319_v24 }
  0xc6   :  { %v1813_v27 = vpop.permute.xlu0 %1812  ;;  %2043 = vmatprep.mubr.f32.mxu0 %v4846_v5 }
  0xc7   :  { %v1820_v28 = vsel %vm1816_vm8, %v1811_v22, %v1813_v27  ;;  %v1821_v29 = vsel %vm1816_vm8, %v1813_v27, %v1815_v26  ;;  %v2418_v22 = vld [vmem:[%s6274_s3 + $0x68] sm:$0xff]  ;;  %v2417_v26 = vld [vmem:[%s6274_s3 + $0x60] sm:$0xff]  ;;  %v2419_v27 = vld [vmem:[%s6274_s3 + $0x70] sm:$0xff]  ;;  %vm3854_vm8 = vcmask 516480  }
  0xc8   :  { %4323 = vmatprep.subr.msk.mxu1 %vm78_vm1, %v1820_v28  ;;  %4327 = vmatpush1.msk.msra.mxu0 %vm78_vm1, %v1821_v29  ;;  %v2063_v31 = vpop.permute.xlu1 %2062  ;;  %v4446_v25 = vpack.c.bf16 %v2420_v23, %v2418_v22  ;;  %v2422_v28 = vld [vmem:[%s6274_s3 + $0x88] sm:$0xff]  ;;  %v2424_v29 = vld [vmem:[%s6274_s3 + $0x98] sm:$0xff]  ;;  %v2453_v23 = vld [vmem:[%s6274_s3 + $0x180] sm:$0xff] }
  0xc9   :  { %4324 = vmatpush1.msk.msra.mxu1 %vm78_vm1, %v1819_v30  ;;  %4328 = vmatmul.mubr.msk.f32.vlgmr.msra.gmra.mrb[0].mxu0 %vm74_vm2, %v4319_v24  ;;  %v4448_v30 = vpack.c.bf16 %v2419_v27, %v2417_v26  ;;  %v2460_v26 = vld [vmem:[%s6274_s3 + $0x1b8] sm:$0xff] }
  0xca   :  { %v2061_v32 = vpop.permute.xlu0 %2060  ;;  %4325 = vmatmul.mubr.msk.f32.vlgmr.msra.gmra.mrb[2].mxu1 %vm74_vm2, %v4319_v24  ;;  %2155 = vmatprep.mubr.f32.mxu0 %v4846_v5  ;;  %v4444_v24 = vpack.c.bf16 %v2415_v21, %v2413_v20  ;;  %v2456_v20 = vld [vmem:[%s6274_s3 + $0x198] sm:$0xff] }
  0xcb   :  { %v2072_v33 = vsel %vm2070_vm9, %v2061_v32, %v2063_v31  ;;  %2226 = vmatprep.mubr.f32.mxu1 %v4846_v5 }
  0xcc   :  { %4330 = vmatprep.subr.msk.mxu0 %vm78_vm1, %v2072_v33  ;;  %v2065_v34 = vpop.permute.xlu1 %2064  ;;  %v2423_v33 = vld [vmem:[%s6274_s3 + $0x90] sm:$0xff] }
  0xcd   :  { %v2073_v42 = vsel %vm2070_vm9, %v2063_v31, %v2065_v34  ;;  %v4450_v31 = vpack.c.bf16 %v2424_v29, %v2422_v28  ;;  %v2457_v29 = vld [vmem:[%s6274_s3 + $0x1a0] sm:$0xff] }
  0xce   :  { %v2059_v35 = vpop.permute.xlu0 %2058 }
  0xcf   :  { %v2071_v37 = vsel %vm2070_vm9, %v2059_v35, %v2061_v32  ;;  %v2421_v32 = vld [vmem:[%s6274_s3 + $0x80] sm:$0xff]  ;;  %v2428_v35 = vld [vmem:[%s6274_s3 + $0xb8] sm:$0xff] }
  0xd0   :  { %4331 = vmatpush1.msk.msra.mxu0 %vm78_vm1, %v2071_v37  ;;  %v2069_v38 = vpop.permute.xlu1 %2068 }
  0xd1   :  { %4332 = vmatmul.mubr.msk.f32.vlgmr.msra.gmra.mrb[2].mxu0 %vm74_vm2, %v4329_v36  ;;  %4336 = vmatprep.subr.msk.mxu0 %vm78_vm1, %v2069_v38 }
  0xd2   :  { %v2067_v39 = vpop.permute.xlu0 %2066  ;;  %2297 = vmatprep.mubr.f32.mxu0 %v4846_v5 }
  0xd3   :  { %v2074_v40 = vsel %vm2070_vm9, %v2065_v34, %v2067_v39  ;;  %v2075_v41 = vsel %vm2070_vm9, %v2067_v39, %v2069_v38  ;;  %v2426_v34 = vld [vmem:[%s6274_s3 + $0xa8] sm:$0xff]  ;;  %v2425_v38 = vld [vmem:[%s6274_s3 + $0xa0] sm:$0xff]  ;;  %v2427_v39 = vld [vmem:[%s6274_s3 + $0xb0] sm:$0xff]  ;;  %vm3867_vm9 = vcmask 647680  }
  0xd4   :  { %4333 = vmatprep.subr.msk.mxu1 %vm78_vm1, %v2074_v40  ;;  %4337 = vmatpush1.msk.msra.mxu0 %vm78_vm1, %v2075_v41  ;;  %v4454_v37 = vpack.c.bf16 %v2428_v35, %v2426_v34  ;;  %v2430_v40 = vld [vmem:[%s6274_s3 + $0xc8] sm:$0xff]  ;;  %v2432_v41 = vld [vmem:[%s6274_s3 + $0xd8] sm:$0xff]  ;;  %v2461_v35 = vld [vmem:[%s6274_s3 + $0x1c0] sm:$0xff] }
  0xd5   :  { %4334 = vmatpush1.msk.msra.mxu1 %vm78_vm1, %v2073_v42  ;;  %4338 = vmatmul.mubr.msk.f32.vlgmr.msra.gmra.mrb[0].mxu0 %vm74_vm2, %v4329_v36  ;;  %v4456_v42 = vpack.c.bf16 %v2427_v39, %v2425_v38  ;;  %v2466_v38 = vld [vmem:[%s6274_s3 + $0x1e8] sm:$0xff]  ;;  %v2468_v39 = vld [vmem:[%s6274_s3 + $0x1f8] sm:$0xff]  ;;  %vm3559_vm1 = vcmask 867328  }
  0xd6   :  { %4335 = vmatmul.mubr.msk.f32.vlgmr.msra.gmra.mrb[2].mxu1 %vm74_vm2, %v4329_v36  ;;  %2954 = vmatprep.mubr.f32.mxu0 %v4846_v5  ;;  %v4452_v36 = vpack.c.bf16 %v2423_v33, %v2421_v32  ;;  %v2462_v32 = vld [vmem:[%s6274_s3 + $0x1c8] sm:$0xff]  ;;  %v2464_v33 = vld [vmem:[%s6274_s3 + $0x1d8] sm:$0xff]  ;;  %vm4861_vm2 = vmmov 1  }
  0xd7   :  { %4435 = vmatprep.subr.bf16.mxu1 %v4434_v8  ;;  %v2448_v8 = vld [vmem:[%s6274_s3 + $0x158] sm:$0xff]  ;;  %v4490_v34 = vpack.c.bf16 %v2464_v33, %v2462_v32  ;;  %v2483_v32 = vld [vmem:[%s6274_s3 + $0x270] sm:$0xff]  ;;  %v2486_v33 = vld [vmem:[%s6274_s3 + $0x288] sm:$0xff] }
  0xd8   :  { %4437 = vmatpush1.bf16.msra.mxu1 %v4436_v12  ;;  %v4474_v10 = vpack.c.bf16 %v2448_v8, %v2446_v7  ;;  %v2447_v12 = vld [vmem:[%s6274_s3 + $0x150] sm:$0xff]  ;;  %v2474_v8 = vld [vmem:[%s6274_s3 + $0x228] sm:$0xff] }
  0xd9   :  { %4439 = vmatprep.subr.bf16.mxu1 %v4438_v13  ;;  %v2450_v13 = vld [vmem:[%s6274_s3 + $0x168] sm:$0xff]  ;;  %v4476_v15 = vpack.c.bf16 %v2447_v12, %v2445_v11 }
  0xda   :  { %v4478_v16 = vpack.c.bf16 %v2452_v14, %v2450_v13 }
  0xdc   :  { %4441 = vmatpush1.bf16.msra.mxu1 %v4440_v18  ;;  %v2451_v18 = vld [vmem:[%s6274_s3 + $0x170] sm:$0xff] }
  0xdd   :  { %4443 = vmatprep.subr.bf16.mxu1 %v4442_v19  ;;  %v2454_v19 = vld [vmem:[%s6274_s3 + $0x188] sm:$0xff]  ;;  %v4480_v21 = vpack.c.bf16 %v2451_v18, %v2449_v17 }
  0xde   :  { %v4482_v22 = vpack.c.bf16 %v2456_v20, %v2454_v19  ;;  %v2473_v20 = vld [vmem:[%s6274_s3 + $0x220] sm:$0xff] }
  0xe0   :  { %4445 = vmatpush1.bf16.msra.mxu1 %v4444_v24  ;;  %v2455_v24 = vld [vmem:[%s6274_s3 + $0x190] sm:$0xff] }
  0xe1   :  { %4447 = vmatprep.subr.bf16.mxu1 %v4446_v25  ;;  %v2458_v25 = vld [vmem:[%s6274_s3 + $0x1a8] sm:$0xff]  ;;  %v4484_v27 = vpack.c.bf16 %v2455_v24, %v2453_v23 }
  0xe2   :  { %v4486_v28 = vpack.c.bf16 %v2460_v26, %v2458_v25  ;;  %v2477_v26 = vld [vmem:[%s6274_s3 + $0x240] sm:$0xff] }
  0xe3   :  { %v2314_v46 = vpop.permute.xlu0 %2313 }
  0xe4   :  { %4449 = vmatpush1.bf16.msra.mxu1 %v4448_v30  ;;  %v2459_v30 = vld [vmem:[%s6274_s3 + $0x1b0] sm:$0xff] }
  0xe5   :  { %4451 = vmatprep.subr.bf16.mxu1 %v4450_v31  ;;  %v4488_v31 = vpack.c.bf16 %v2459_v30, %v2457_v29  ;;  %v2484_v29 = vld [vmem:[%s6274_s3 + $0x278] sm:$0xff] }
  0xe8   :  { %4453 = vmatpush1.bf16.msra.mxu1 %v4452_v36  ;;  %v2463_v36 = vld [vmem:[%s6274_s3 + $0x1d0] sm:$0xff] }
  0xe9   :  { %4455 = vmatprep.subr.bf16.mxu1 %v4454_v37  ;;  %v4492_v37 = vpack.c.bf16 %v2463_v36, %v2461_v35 }
  0xec   :  { %4457 = vmatpush1.bf16.msra.mxu1 %v4456_v42  ;;  %v2465_v42 = vld [vmem:[%s6274_s3 + $0x1e0] sm:$0xff] }
 0x151   :  { %v157_v43 = vpop.f32.mrb[0].mxu1 }
 0x152   :  { %v159_v44 = vpop.f32.mrb[1].mxu1 }
 0x1a4   :  { %v2157_v45 = vpop.f32.mrb[2].mxu0 }
 0x1a5   :  { %v4665_v47 = vadd.f32 %v2157_v45, %v157_v43  ;;  %v2159_v48 = vpop.f32.mrb[3].mxu0  ;;  %v4458_v43 = vpack.c.bf16 %v2432_v41, %v2430_v40  ;;  %v2431_v45 = vld [vmem:[%s6274_s3 + $0xd0] sm:$0xff]  ;;  %v4494_v41 = vpack.c.bf16 %v2468_v39, %v2466_v38  ;;  %v2490_v39 = vld [vmem:[%s6274_s3 + $0x2a8] sm:$0xff] }
 0x1a6   :  { %v4666_v49 = vadd.f32 %v2159_v48, %v159_v44  ;;  %v2429_v44 = vld [vmem:[%s6274_s3 + $0xc0] sm:$0xff]  ;;  %v2487_v38 = vld [vmem:[%s6274_s3 + $0x290] sm:$0xff] }
 0x1a7   :  { %v2316_v50 = vadd.f32 %v4665_v47, %v2314_v46  ;;  %v2436_v47 = vld [vmem:[%s6274_s3 + $0xf8] sm:$0xff]  ;;  %v4460_v48 = vpack.c.bf16 %v2431_v45, %v2429_v44  ;;  %4459 = vmatprep.subr.bf16.mxu1 %v4458_v43  ;;  %v2467_v43 = vld [vmem:[%s6274_s3 + $0x1f0] sm:$0xff] }
 0x1a8   :  { %v2299_v51 = vpop.f32.mrb[0].mxu0  ;;  %v2317_v52 = vadd.f32 %v4666_v49, %v2314_v46 }
 0x1a9   :  { %v2320_v53 = vadd.f32 %v2314_v46, %v2299_v51  ;;  %v2228_v54 = vpop.f32.mrb[2].mxu1  ;;  %v2301_v55 = vpop.f32.mrb[1].mxu0  ;;  %v5232_v56 = vmax.f32 %v2316_v50, 0.0  ;;  %v2433_v50 = vld [vmem:[%s6274_s3 + $0xe0] sm:$0xff]  ;;  %v2435_v51 = vld [vmem:[%s6274_s3 + $0xf0] sm:$0xff]  ;;  %4461 = vmatpush1.bf16.msra.mxu1 %v4460_v48 }
 0x1aa   :  { %v2318_v57 = vadd.f32 %v2314_v46, %v2228_v54  ;;  %v2321_v58 = vadd.f32 %v2314_v46, %v2301_v55  ;;  %v2230_v59 = vpop.f32.mrb[3].mxu1  ;;  %v5234_v60 = vmax.f32 %v2317_v52, 0.0  ;;  %v2438_v52 = vld [vmem:[%s6274_s3 + $0x108] sm:$0xff]  ;;  %v4464_v54 = vpack.c.bf16 %v2435_v51, %v2433_v50 }
 0x1ab   :  { %v5236_v61 = vmax.f32 %v2320_v53, 0.0  ;;  %v2319_v62 = vadd.f32 %v2314_v46, %v2230_v59  ;;  %2328 = vst [vmem:[%s6282_s11] sm:$0xff] %v5232_v56  ;;  %v2434_v46 = vld [vmem:[%s6274_s3 + $0xe8] sm:$0xff]  ;;  %v2440_v53 = vld [vmem:[%s6274_s3 + $0x118] sm:$0xff] }
 0x1ac   :  { %v5242_v63 = vmax.f32 %v2318_v57, 0.0  ;;  %v5244_v0 = vmax.f32 %v2321_v58, 0.0  ;;  %2329 = vst [vmem:[%s6282_s11 + $0x8] sm:$0xff] %v5234_v60  ;;  %v4462_v49 = vpack.c.bf16 %v2436_v47, %v2434_v46  ;;  %v4466_v55 = vpack.c.bf16 %v2440_v53, %v2438_v52  ;;  %v2437_v57 = vld [vmem:[%s6274_s3 + $0x100] sm:$0xff]  ;;  %v2439_v58 = vld [vmem:[%s6274_s3 + $0x110] sm:$0xff]  ;;  %v2442_v59 = vld [vmem:[%s6274_s3 + $0x128] sm:$0xff] }
 0x1ad   :  { %2332 = vst [vmem:[%s6282_s11 + $0x20] sm:$0xff] %v5236_v61  ;;  %v5254_v1 = vmax.f32 %v2319_v62, 0.0  ;;  %v2444_v62 = vld [vmem:[%s6274_s3 + $0x138] sm:$0xff]  ;;  %v4496_v46 = vpack.c.bf16 %v2467_v43, %v2465_v42  ;;  %v2489_v43 = vld [vmem:[%s6274_s3 + $0x2a0] sm:$0xff] }
 0x1ae   :  { %2330 = vst [vmem:[%s6282_s11 + $0x10] sm:$0xff] %v5242_v63  ;;  %2334 = vst.msk [vmem:[%s6282_s11 + $0x28] sm:$0xff] %vm2333_vm10, %v5244_v0  ;;  %v4778_v2 = vpack.i.bf16 %v5242_v63, %v5234_v60  ;;  %4463 = vmatprep.subr.bf16.mxu1 %v4462_v49 }
 0x1af   :  { %2331 = vst [vmem:[%s6282_s11 + $0x18] sm:$0xff] %v5254_v1  ;;  %v4783_v3 = vpack.i.bf16 %v5232_v56, %v5254_v1  ;;  %4465 = vmatpush1.bf16.msra.mxu1 %v4464_v54  ;;  %s4858_s11 = smov 107  }
 0x1b0   :  { %4779 = vrot.lane.b32.xlu1 %v4778_v2, %s4845_s17  ;;  %v4468_v2 = vpack.c.bf16 %v2439_v58, %v2437_v57  ;;  %4467 = vmatprep.subr.bf16.mxu1 %v4466_v55  ;;  %v2470_v58 = vld [vmem:[%s6274_s3 + $0x208] sm:$0xff] }
 0x1b3   :  { %4469 = vmatpush1.bf16.msra.mxu1 %v4468_v2 }
 0x1b4   :  { %4784 = vrot.lane.b32.xlu1 %v4783_v3, %s4845_s17  ;;  %v4470_v3 = vpack.c.bf16 %v2444_v62, %v2442_v59  ;;  %v2472_v59 = vld [vmem:[%s6274_s3 + $0x218] sm:$0xff] }
 0x1b5   :  { %v4498_v62 = vpack.c.bf16 %v2472_v59, %v2470_v58  ;;  %v2499_v58 = vld [vmem:[%s6274_s3 + $0x2f0] sm:$0xff]  ;;  %v2502_v59 = vld [vmem:[%s6274_s3 + $0x308] sm:$0xff] }
 0x1b6   :  { %4471 = vmatprep.subr.bf16.mxu1 %v4470_v3  ;;  %v2469_v3 = vld [vmem:[%s6274_s3 + $0x200] sm:$0xff] }
 0x1b7   :  { %4473 = vmatpush1.bf16.msra.mxu1 %v4472_v9  ;;  %v2476_v9 = vld [vmem:[%s6274_s3 + $0x238] sm:$0xff] }
 0x1b8   :  { %4475 = vmatprep.subr.bf16.mxu1 %v4474_v10  ;;  %v4502_v19 = vpack.c.bf16 %v2476_v9, %v2474_v8 }
 0x1bb   :  { %4477 = vmatpush1.bf16.msra.mxu1 %v4476_v15 }
 0x1bc   :  { %4479 = vmatprep.subr.bf16.mxu1 %v4478_v16  ;;  %v4500_v16 = vpack.c.bf16 %v2471_v4, %v2469_v3  ;;  %v2501_v3 = vld [vmem:[%s6274_s3 + $0x300] sm:$0xff]  ;;  %v2503_v4 = vld [vmem:[%s6274_s3 + $0x310] sm:$0xff] }
 0x1bd   :  { %v4532_v8 = vpack.c.bf16 %v2503_v4, %v2501_v3 }
 0x1bf   :  { %4481 = vmatpush1.bf16.msra.mxu1 %v4480_v21  ;;  %v2475_v21 = vld [vmem:[%s6274_s3 + $0x230] sm:$0xff] }
 0x1c0   :  { %4483 = vmatprep.subr.bf16.mxu1 %v4482_v22  ;;  %v2478_v22 = vld [vmem:[%s6274_s3 + $0x248] sm:$0xff]  ;;  %v4504_v23 = vpack.c.bf16 %v2475_v21, %v2473_v20  ;;  %v2516_v21 = vld [vmem:[%s6274_s3 + $0x378] sm:$0xff] }
 0x1c1   :  { %v2514_v20 = vld [vmem:[%s6274_s3 + $0x368] sm:$0xff] }
 0x1c3   :  { %4485 = vmatpush1.bf16.msra.mxu1 %v4484_v27  ;;  %v2479_v27 = vld [vmem:[%s6274_s3 + $0x250] sm:$0xff] }
 0x1c4   :  { %4487 = vmatprep.subr.bf16.mxu1 %v4486_v28  ;;  %v2482_v28 = vld [vmem:[%s6274_s3 + $0x268] sm:$0xff] }
 0x1c5   :  { %v4510_v30 = vpack.c.bf16 %v2484_v29, %v2482_v28  ;;  %v2517_v29 = vld [vmem:[%s6274_s3 + $0x380] sm:$0xff] }
 0x1c7   :  { %4489 = vmatpush1.bf16.msra.mxu1 %v4488_v31  ;;  %v2481_v31 = vld [vmem:[%s6274_s3 + $0x260] sm:$0xff] }
 0x1c8   :  { %4491 = vmatprep.subr.bf16.mxu1 %v4490_v34  ;;  %v2488_v34 = vld [vmem:[%s6274_s3 + $0x298] sm:$0xff]  ;;  %v4512_v35 = vpack.c.bf16 %v2483_v32, %v2481_v31 }
 0x1c9   :  { %v4514_v36 = vpack.c.bf16 %v2488_v34, %v2486_v33  ;;  %v2524_v31 = vld [vmem:[%s6274_s3 + $0x3b8] sm:$0xff]  ;;  %v2521_v34 = vld [vmem:[%s6274_s3 + $0x3a0] sm:$0xff] }
 0x1cb   :  { %4493 = vmatpush1.bf16.msra.mxu1 %v4492_v37  ;;  %v2485_v37 = vld [vmem:[%s6274_s3 + $0x280] sm:$0xff] }
 0x1cc   :  { %4495 = vmatprep.subr.bf16.mxu1 %v4494_v41  ;;  %v4516_v41 = vpack.c.bf16 %v2487_v38, %v2485_v37  ;;  %v2528_v37 = vld [vmem:[%s6274_s3 + $0x3d8] sm:$0xff] }
 0x1cf   :  { %4497 = vmatpush1.bf16.msra.mxu1 %v4496_v46  ;;  %v2496_v46 = vld [vmem:[%s6274_s3 + $0x2d8] sm:$0xff] }
 0x1d0   :  { %4499 = vmatprep.subr.bf16.mxu1 %v4498_v62  ;;  %v2504_v62 = vld [vmem:[%s6274_s3 + $0x318] sm:$0xff] }
 0x222   :  { %v4780_v40 = vpop.permute.xlu1 %4779 }
 0x223   :  { %v4782_v44 = vunpack.i.h.bf16 %v4780_v40  ;;  %v4781_v45 = vunpack.i.l.bf16 %v4780_v40  ;;  %v2492_v40 = vld [vmem:[%s6274_s3 + $0x2b8] sm:$0xff] }
 0x224   :  { %v4518_v42 = vpack.c.bf16 %v2492_v40, %v2490_v39  ;;  %v2525_v40 = vld [vmem:[%s6274_s3 + $0x3c0] sm:$0xff] }
 0x225   :  { %v2351_v48 = vsel %vm68_vm0, %v4781_v45, %v4782_v44 }
 0x226   :  { %v4785_v47 = vpop.permute.xlu1 %4784  ;;  %v2360_v54 = vmax.f32 %v5234_v60, %v2351_v48 }
 0x227   :  { %v4787_v49 = vunpack.i.h.bf16 %v4785_v47  ;;  %v4786_v50 = vunpack.i.l.bf16 %v4785_v47 }
 0x229   :  { %v2352_v51 = vsel %vm68_vm0, %v4782_v44, %v4786_v50  ;;  %v2350_v52 = vsel %vm68_vm0, %v4787_v49, %v4781_v45  ;;  %v2491_v44 = vld [vmem:[%s6274_s3 + $0x2b0] sm:$0xff]  ;;  %v2494_v45 = vld [vmem:[%s6274_s3 + $0x2c8] sm:$0xff]  ;;  %v2493_v49 = vld [vmem:[%s6274_s3 + $0x2c0] sm:$0xff] }
 0x22a   :  { %v2359_v53 = vmax.f32 %v5232_v56, %v2350_v52  ;;  %v5473_v55 = vmax.f32 %v5242_v63, %v2352_v51  ;;  %v4520_v47 = vpack.c.bf16 %v2491_v44, %v2489_v43  ;;  %v4522_v48 = vpack.c.bf16 %v2496_v46, %v2494_v45  ;;  %v2498_v51 = vld [vmem:[%s6274_s3 + $0x2e8] sm:$0xff]  ;;  %v2500_v52 = vld [vmem:[%s6274_s3 + $0x2f8] sm:$0xff]  ;;  %v2529_v46 = vld [vmem:[%s6274_s3 + $0x3e0] sm:$0xff] }
 0x22b   :  { %v2532_v43 = vld [vmem:[%s6274_s3 + $0x3f8] sm:$0xff] }
 0x22c   :  { %2378 = vrot.lane.b32.xlu1 %v2359_v53, %s4848_s20  ;;  %v4788_v57 = vpack.i.bf16 %v5473_v55, %v2360_v54 }
 0x22e   :  { %4789 = vrot.lane.b32.xlu0 %v4788_v57, %s4848_s20  ;;  %v2497_v57 = vld [vmem:[%s6274_s3 + $0x2e0] sm:$0xff] }
 0x230   :  { %2365 = vrot.lane.b32.xlu1 %v5244_v0, %s4845_s17 }
 0x232   :  { %2348 = vrot.lane.b32.xlu0 %v5236_v61, %s4845_s17 }
 0x29e   :  { %v2379_v56 = vpop.permute.xlu1 %2378 }
 0x2a0   :  { %v5488_v60 = vpop.permute.xlu0 %4789 }
 0x2a1   :  { %v4792_v63 = vunpack.i.h.bf16 %v5488_v60  ;;  %v4791_v2 = vunpack.i.l.bf16 %v5488_v60  ;;  %v2542_v60 = vld [vmem:[%s6274_s3 + $0x448] sm:$0xff] }
 0x2a2   :  { %v2366_v11 = vpop.permute.xlu1 %2365 }
 0x2a3   :  { %v2390_v6 = vsel %vm800_vm4, %v2379_v56, %v4791_v2  ;;  %v2391_v7 = vsel %vm800_vm4, %v4791_v2, %v4792_v63  ;;  %v2371_v24 = vmax.f32 %v5244_v0, %v2366_v11  ;;  %v4508_v0 = vpack.c.bf16 %v2479_v27, %v2477_v26  ;;  %v2520_v26 = vld [vmem:[%s6274_s3 + $0x398] sm:$0xff] }
 0x2a4   :  { %v2400_v10 = vmax.f32 %v2359_v53, %v2390_v6  ;;  %v5508_v12 = vpop.permute.xlu0 %2348  ;;  %v2401_v13 = vmax.f32 %v2360_v54, %v2391_v7  ;;  %v4526_v54 = vpack.c.bf16 %v2500_v52, %v2498_v51  ;;  %v4528_v56 = vpack.c.bf16 %v2499_v58, %v2497_v57  ;;  %v2506_v6 = vld [vmem:[%s6274_s3 + $0x328] sm:$0xff]  ;;  %v2508_v7 = vld [vmem:[%s6274_s3 + $0x338] sm:$0xff]  ;;  %v2533_v52 = vld [vmem:[%s6274_s3 + $0x400] sm:$0xff] }
 0x2a5   :  { %v2353_v14 = vsel %vm68_vm0, %v4786_v50, %v5508_v12  ;;  %v2367_v15 = vsel %vm68_vm0, %v5508_v12, %v2366_v11  ;;  %v2495_v50 = vld [vmem:[%s6274_s3 + $0x2d0] sm:$0xff]  ;;  %v4530_v2 = vpack.c.bf16 %v2504_v62, %v2502_v59  ;;  %v4534_v9 = vpack.c.bf16 %v2508_v7, %v2506_v6  ;;  %v2538_v58 = vld [vmem:[%s6274_s3 + $0x428] sm:$0xff]  ;;  %v2540_v59 = vld [vmem:[%s6274_s3 + $0x438] sm:$0xff] }
 0x2a6   :  { %2638 = vmatprep.mubr.f32.mxu1 %v2401_v13  ;;  %v5515_v17 = vmax.f32 %v5254_v1, %v2353_v14  ;;  %v2370_v18 = vmax.f32 %v5236_v61, %v2367_v15  ;;  %v2480_v1 = vld [vmem:[%s6274_s3 + $0x258] sm:$0xff]  ;;  %v4524_v53 = vpack.c.bf16 %v2495_v50, %v2493_v49  ;;  %v2507_v11 = vld [vmem:[%s6274_s3 + $0x330] sm:$0xff]  ;;  %v2510_v13 = vld [vmem:[%s6274_s3 + $0x348] sm:$0xff]  ;;  %v4566_v6 = vpack.c.bf16 %v2540_v59, %v2538_v58 }
 0x2a7   :  { %2639 = vmatmul.mubr.f32.vlgmr.msra.gmra.mrb[4].mxu1 %v2400_v10  ;;  %v4506_v25 = vpack.c.bf16 %v2480_v1, %v2478_v22  ;;  %v2505_v10 = vld [vmem:[%s6274_s3 + $0x320] sm:$0xff]  ;;  %v2512_v14 = vld [vmem:[%s6274_s3 + $0x358] sm:$0xff]  ;;  %v4542_v1 = vpack.c.bf16 %v2516_v21, %v2514_v20  ;;  %v4352_v58 = vld [vmem:[%s6275_s4 + $0x30] sm:$0xff] }
 0x2a8   :  { %2384 = vrot.lane.b32.xlu0 %v5515_v17, %s4848_s20  ;;  %2386 = vrot.lane.b32.xlu1 %v2370_v18, %s4848_s20  ;;  %v4536_v15 = vpack.c.bf16 %v2507_v11, %v2505_v10  ;;  %v2509_v18 = vld [vmem:[%s6274_s3 + $0x340] sm:$0xff]  ;;  %v2536_v49 = vld [vmem:[%s6274_s3 + $0x418] sm:$0xff] }
 0x2a9   :  { %4501 = vmatpush1.bf16.msra.mxu1 %v4500_v16  ;;  %v4538_v16 = vpack.c.bf16 %v2512_v14, %v2510_v13  ;;  %v2537_v7 = vld [vmem:[%s6274_s3 + $0x420] sm:$0xff]  ;;  %v2543_v10 = vld [vmem:[%s6274_s3 + $0x450] sm:$0xff]  ;;  %v2546_v11 = vld [vmem:[%s6274_s3 + $0x468] sm:$0xff] }
 0x2aa   :  { %4503 = vmatprep.subr.bf16.mxu1 %v4502_v19  ;;  %v2511_v19 = vld [vmem:[%s6274_s3 + $0x350] sm:$0xff]  ;;  %v2548_v13 = vld [vmem:[%s6274_s3 + $0x478] sm:$0xff] }
 0x2ab   :  { %v4540_v22 = vpack.c.bf16 %v2511_v19, %v2509_v18  ;;  %v2547_v18 = vld [vmem:[%s6274_s3 + $0x470] sm:$0xff]  ;;  %v2550_v19 = vld [vmem:[%s6274_s3 + $0x488] sm:$0xff]  ;;  %v2552_v20 = vld [vmem:[%s6274_s3 + $0x498] sm:$0xff] }
 0x2ac   :  { %2388 = vrot.lane.b32.xlu0 %v2371_v24, %s4848_s20  ;;  %v2515_v24 = vld [vmem:[%s6274_s3 + $0x370] sm:$0xff] }
 0x2ad   :  { %4505 = vmatpush1.bf16.msra.mxu1 %v4504_v23  ;;  %v2513_v23 = vld [vmem:[%s6274_s3 + $0x360] sm:$0xff] }
 0x2ae   :  { %4507 = vmatprep.subr.bf16.mxu1 %v4506_v25  ;;  %v2518_v25 = vld [vmem:[%s6274_s3 + $0x388] sm:$0xff]  ;;  %v4544_v27 = vpack.c.bf16 %v2515_v24, %v2513_v23  ;;  %v2551_v23 = vld [vmem:[%s6274_s3 + $0x490] sm:$0xff] }
 0x2af   :  { %v4546_v28 = vpack.c.bf16 %v2520_v26, %v2518_v25  ;;  %v2554_v24 = vld [vmem:[%s6274_s3 + $0x4a8] sm:$0xff]  ;;  %v2556_v25 = vld [vmem:[%s6274_s3 + $0x4b8] sm:$0xff] }
 0x2b1   :  { %4509 = vmatpush1.bf16.msra.mxu1 %v4508_v0  ;;  %v2519_v0 = vld [vmem:[%s6274_s3 + $0x390] sm:$0xff] }
 0x2b2   :  { %4511 = vmatprep.subr.bf16.mxu1 %v4510_v30  ;;  %v2522_v30 = vld [vmem:[%s6274_s3 + $0x3a8] sm:$0xff]  ;;  %v4548_v32 = vpack.c.bf16 %v2519_v0, %v2517_v29  ;;  %v2555_v29 = vld [vmem:[%s6274_s3 + $0x4b0] sm:$0xff] }
 0x2b3   :  { %v4550_v33 = vpack.c.bf16 %v2524_v31, %v2522_v30  ;;  %v2558_v0 = vld [vmem:[%s6274_s3 + $0x4c8] sm:$0xff]  ;;  %v2560_v30 = vld [vmem:[%s6274_s3 + $0x4d8] sm:$0xff] }
 0x2b5   :  { %4513 = vmatpush1.bf16.msra.mxu1 %v4512_v35  ;;  %v2523_v35 = vld [vmem:[%s6274_s3 + $0x3b0] sm:$0xff] }
 0x2b6   :  { %4515 = vmatprep.subr.bf16.mxu1 %v4514_v36  ;;  %v2526_v36 = vld [vmem:[%s6274_s3 + $0x3c8] sm:$0xff]  ;;  %v4552_v38 = vpack.c.bf16 %v2523_v35, %v2521_v34  ;;  %v2559_v34 = vld [vmem:[%s6274_s3 + $0x4d0] sm:$0xff] }
 0x2b7   :  { %v4554_v39 = vpack.c.bf16 %v2528_v37, %v2526_v36  ;;  %v2562_v37 = vld [vmem:[%s6274_s3 + $0x4e8] sm:$0x1f] }
 0x2b9   :  { %4517 = vmatpush1.bf16.msra.mxu1 %v4516_v41  ;;  %v2527_v41 = vld [vmem:[%s6274_s3 + $0x3d0] sm:$0xff] }
 0x2ba   :  { %4519 = vmatprep.subr.bf16.mxu1 %v4518_v42  ;;  %v2530_v42 = vld [vmem:[%s6274_s3 + $0x3e8] sm:$0xff]  ;;  %v4556_v44 = vpack.c.bf16 %v2527_v41, %v2525_v40  ;;  %v2561_v40 = vld [vmem:[%s6274_s3 + $0x4e0] sm:$0x1f] }
 0x2bb   :  { %v4558_v45 = vpack.c.bf16 %v2532_v43, %v2530_v42 }
 0x2bd   :  { %4521 = vmatpush1.bf16.msra.mxu1 %v4520_v47  ;;  %v2531_v47 = vld [vmem:[%s6274_s3 + $0x3f0] sm:$0xff] }
 0x2be   :  { %4523 = vmatprep.subr.bf16.mxu1 %v4522_v48  ;;  %v2534_v48 = vld [vmem:[%s6274_s3 + $0x408] sm:$0xff]  ;;  %v4560_v50 = vpack.c.bf16 %v2531_v47, %v2529_v46 }
 0x2bf   :  { %v4562_v51 = vpack.c.bf16 %v2536_v49, %v2534_v48  ;;  %v4348_v48 = vld [vmem:[%s6275_s4 + $0x20] sm:$0xff] }
 0x2c1   :  { %4525 = vmatpush1.bf16.msra.mxu1 %v4524_v53  ;;  %v2535_v53 = vld [vmem:[%s6274_s3 + $0x410] sm:$0xff] }
 0x2c2   :  { %4527 = vmatprep.subr.bf16.mxu1 %v4526_v54  ;;  %v4564_v4 = vpack.c.bf16 %v2535_v53, %v2533_v52  ;;  %v4349_v52 = vld [vmem:[%s6275_s4 + $0x28] sm:$0xff] }
 0x2c5   :  { %4529 = vmatpush1.bf16.msra.mxu1 %v4528_v56 }
 0x2c6   :  { %4531 = vmatprep.subr.bf16.mxu1 %v4530_v2 }
 0x2c9   :  { %4533 = vmatpush1.bf16.msra.mxu1 %v4532_v8  ;;  %v2539_v8 = vld [vmem:[%s6274_s3 + $0x430] sm:$0xff] }
 0x2ca   :  { %4535 = vmatprep.subr.bf16.mxu1 %v4534_v9  ;;  %v2541_v9 = vld [vmem:[%s6274_s3 + $0x440] sm:$0xff] }
 0x2cb   :  { %v4572_v14 = vpack.c.bf16 %v2543_v10, %v2541_v9  ;;  %v4360_v9 = vld [vmem:[%s6275_s4 + $0x50] sm:$0xff] }
 0x2cc   :  { %v4342_v10 = vld [vmem:[%s6275_s4 + $0x10] sm:$0xff] }
 0x2cd   :  { %4537 = vmatpush1.bf16.msra.mxu1 %v4536_v15  ;;  %v4574_v15 = vpack.c.bf16 %v2548_v13, %v2546_v11 }
 0x2ce   :  { %4539 = vmatprep.subr.bf16.mxu1 %v4538_v16  ;;  %v2545_v16 = vld [vmem:[%s6274_s3 + $0x460] sm:$0xff] }
 0x2cf   :  { %v4576_v21 = vpack.c.bf16 %v2547_v18, %v2545_v16  ;;  %v4364_v16 = vld [vmem:[%s6275_s4 + $0x60] sm:$0xff] }
 0x2d1   :  { %4541 = vmatpush1.bf16.msra.mxu1 %v4540_v22  ;;  %v4578_v22 = vpack.c.bf16 %v2552_v20, %v2550_v19  ;;  %v4365_v20 = vld [vmem:[%s6275_s4 + $0x68] sm:$0xff] }
 0x2d2   :  { %4543 = vmatprep.subr.bf16.mxu1 %v4542_v1  ;;  %v2549_v1 = vld [vmem:[%s6274_s3 + $0x480] sm:$0xff] }
 0x2d3   :  { %v4580_v26 = vpack.c.bf16 %v2551_v23, %v2549_v1  ;;  %v4369_v23 = vld [vmem:[%s6275_s4 + $0x78] sm:$0xff] }
 0x2d5   :  { %4545 = vmatpush1.bf16.msra.mxu1 %v4544_v27  ;;  %v4582_v27 = vpack.c.bf16 %v2556_v25, %v2554_v24  ;;  %v4372_v24 = vld [vmem:[%s6275_s4 + $0x80] sm:$0xff]  ;;  %v4373_v25 = vld [vmem:[%s6275_s4 + $0x88] sm:$0xff] }
 0x2d6   :  { %4547 = vmatprep.subr.bf16.mxu1 %v4546_v28  ;;  %v2553_v28 = vld [vmem:[%s6274_s3 + $0x4a0] sm:$0xff] }
 0x2d7   :  { %v4584_v31 = vpack.c.bf16 %v2555_v29, %v2553_v28 }
 0x2d9   :  { %4549 = vmatpush1.bf16.msra.mxu1 %v4548_v32  ;;  %v4586_v32 = vpack.c.bf16 %v2560_v30, %v2558_v0 }
 0x2da   :  { %4551 = vmatprep.subr.bf16.mxu1 %v4550_v33  ;;  %v2557_v33 = vld [vmem:[%s6274_s3 + $0x4c0] sm:$0xff] }
 0x2db   :  { %v4588_v35 = vpack.c.bf16 %v2559_v34, %v2557_v33  ;;  %v3714_v34 = vld [vmem:[%s6277_s6] sm:$0xff] }
 0x2dd   :  { %4553 = vmatpush1.bf16.msra.mxu1 %v4552_v38 }
 0x2de   :  { %4555 = vmatprep.subr.bf16.mxu1 %v4554_v39  ;;  %v2363_v39 = vmax.f32 %v5236_v61, %v5508_v12  ;;  %v2787_v61 = vld [vmem:[%s6275_s4] sm:$0xff]  ;;  %v2788_v12 = vld [vmem:[%s6275_s4 + $0x8] sm:$0xff] }
 0x2e1   :  { %4557 = vmatpush1.bf16.msra.mxu1 %v4556_v44  ;;  %v3651_v44 = vld [vmem:[%s6276_s5 + $0x8] sm:$0xff] }
 0x2e2   :  { %4559 = vmatprep.subr.bf16.mxu1 %v4558_v45  ;;  %v3650_v45 = vld [vmem:[%s6276_s5] sm:$0xff] }
 0x2e5   :  { %4561 = vmatpush1.bf16.msra.mxu1 %v4560_v50 }
 0x2e6   :  { %4563 = vmatprep.subr.bf16.mxu1 %v4562_v51 }
 0x31a   :  { %v2385_v54 = vpop.permute.xlu0 %2384  ;;  %v2387_v57 = vpop.permute.xlu1 %2386 }
 0x31b   :  { %v2392_v62 = vsel %vm800_vm4, %v4792_v63, %v2385_v54  ;;  %v2393_v56 = vsel %vm800_vm4, %v2385_v54, %v2387_v57  ;;  %v4568_v63 = vpack.c.bf16 %v2539_v8, %v2537_v7 }
 0x31c   :  { %v2402_v2 = vmax.f32 %v5473_v55, %v2392_v62  ;;  %v2403_v3 = vmax.f32 %v5515_v17, %v2393_v56  ;;  %v2544_v55 = vld [vmem:[%s6274_s3 + $0x458] sm:$0xff]  ;;  %s4855_s3 = smov 118  }
 0x31d   :  { %v4570_v17 = vpack.c.bf16 %v2544_v55, %v2542_v60  ;;  %v4357_v55 = vld [vmem:[%s6275_s4 + $0x48] sm:$0xff] }
 0x31e   :  { %2709 = vmatprep.mubr.f32.mxu1 %v2403_v3  ;;  %v2389_v36 = vpop.permute.xlu0 %2388 }
 0x31f   :  { %2710 = vmatmul.mubr.f32.vlgmr.msra.gmra.mrb[4].mxu1 %v2402_v2  ;;  %v2394_v38 = vsel %vm800_vm4, %v2387_v57, %v2389_v36  ;;  %v4353_v2 = vld [vmem:[%s6275_s4 + $0x38] sm:$0xff]  ;;  %v3716_v36 = vld [vmem:[%s6277_s6 + $0x10] sm:$0xff]  ;;  %vm3738_vm4 = vcmask 498688  }
 0x320   :  { %4565 = vmatpush1.bf16.msra.mxu1 %v4564_v4  ;;  %2780 = vmatprep.mubr.f32.mxu1 %v4846_v5  ;;  %v2404_v41 = vmax.f32 %v2363_v39, %v2394_v38  ;;  %v4860_v38 = vmov 0.0|0.0  }
 0x321   :  { %4567 = vmatprep.subr.bf16.mxu1 %v4566_v6  ;;  %v4356_v6 = vld [vmem:[%s6275_s4 + $0x40] sm:$0xff] }
 0x324   :  { %4569 = vmatpush1.bf16.msra.mxu1 %v4568_v63 }
 0x325   :  { %4571 = vmatprep.subr.bf16.mxu1 %v4570_v17 }
 0x328   :  { %4573 = vmatpush1.bf16.msra.mxu1 %v4572_v14  ;;  %v4361_v14 = vld [vmem:[%s6275_s4 + $0x58] sm:$0xff] }
 0x329   :  { %4575 = vmatprep.subr.bf16.mxu1 %v4574_v15  ;;  %v4343_v15 = vld [vmem:[%s6275_s4 + $0x18] sm:$0xff] }
 0x32c   :  { %4577 = vmatpush1.bf16.msra.mxu1 %v4576_v21 }
 0x32d   :  { %4579 = vmatprep.subr.bf16.mxu1 %v4578_v22  ;;  %v4368_v22 = vld [vmem:[%s6275_s4 + $0x70] sm:$0xff]  ;;  %s4863_s4 = smov 112  }
 0x330   :  { %4581 = vmatpush1.bf16.msra.mxu1 %v4580_v26 }
 0x331   :  { %4583 = vmatprep.subr.bf16.mxu1 %v4582_v27 }
 0x334   :  { %4585 = vmatpush1.bf16.msra.mxu1 %v4584_v31 }
 0x335   :  { %4587 = vmatprep.subr.bf16.mxu1 %v4586_v32 }
 0x338   :  { %4589 = vmatpush1.bf16.msra.mxu1 %v4588_v35  ;;  %v3715_v35 = vld [vmem:[%s6277_s6 + $0x8] sm:$0xff] }
 0x339   :  { %4339 = vmatprep.subr.msk.mxu1 %vm2567_vm11, %v2562_v37  ;;  %v4591_v39 = vpack.c.bf16 %v3715_v35, %v3714_v34 }
 0x33c   :  { %4340 = vmatpush1.msk.msra.mxu1 %vm2567_vm11, %v2561_v40  ;;  %v3717_v40 = vld [vmem:[%s6277_s6 + $0x18] sm:$0xff] }
 0x33d   :  { %4341 = vmatmul.mubr.msk.f32.vlgmr.msra.gmra.mrb[4].mxu1 %vm2563_vm12, %v2404_v41 }
 0x33e   :  { %2871 = vmatprep.mubr.f32.mxu1 %v4846_v5 }
 0x410   :  { %v2782_v42 = vpop.f32.mrb[4].mxu1 }
 0x411   :  { %2970 = vrot.lane.b32.xlu1 %v2782_v42, %s4847_s0  ;;  %v2784_v43 = vpop.f32.mrb[5].mxu1 }
 0x412   :  { %2972 = vrot.lane.b32.xlu0 %v2784_v43, %s4847_s0  ;;  %2890 = vmatprep.subr.mxu0 %v2784_v43  ;;  %s4857_s0 = smov 116  }
 0x413   :  { %2891 = vmatpush1.msra.mxu0 %v2782_v42 }
 0x414   :  { %4346 = vmatmul.mubr.msk.f32.vlgmr.msra.gmra.mrb[4].mxu0 %vm2333_vm10, %v2787_v61 }
 0x415   :  { %3067 = vrot.lane.b32.xlu1 %v2782_v42, %s4855_s3  ;;  %2960 = vmatprep.mubr.f32.mxu0 %v4846_v5 }
 0x416   :  { %3069 = vrot.lane.b32.xlu0 %v2784_v43, %s4855_s3 }
 0x418   :  { %4347 = vmatmul.mubr.msk.f32.gmra.mrb[6].mxu0 %vm2333_vm10, %v2788_v12 }
 0x419   :  { %3165 = vrot.lane.b32.xlu1 %v2782_v42, %s4856_s18  ;;  %3047 = vmatprep.mubr.f32.mxu0 %v4846_v5 }
 0x41a   :  { %3167 = vrot.lane.b32.xlu0 %v2784_v43, %s4856_s18 }
 0x41d   :  { %3262 = vrot.lane.b32.xlu1 %v2782_v42, %s4857_s0 }
 0x41e   :  { %3264 = vrot.lane.b32.xlu0 %v2784_v43, %s4857_s0 }
 0x421   :  { %3360 = vrot.lane.b32.xlu1 %v2782_v42, %s4850_s22 }
 0x422   :  { %3362 = vrot.lane.b32.xlu0 %v2784_v43, %s4850_s22  ;;  %s4867_s22 = smov 48  }
 0x425   :  { %3457 = vrot.lane.b32.xlu1 %v2782_v42, %s4858_s11 }
 0x426   :  { %3459 = vrot.lane.b32.xlu0 %v2784_v43, %s4858_s11 }
 0x429   :  { %2794 = vrot.lane.b32.xlu1 %v2782_v42, %s4845_s17 }
 0x42a   :  { %2796 = vrot.lane.b32.xlu0 %v2784_v43, %s4845_s17 }
 0x42d   :  { %3555 = vrot.lane.b32.xlu1 %v2782_v42, %s4859_s19 }
 0x42e   :  { %3557 = vrot.lane.b32.xlu0 %v2784_v43, %s4859_s19 }
 0x431   :  { %3654 = vperm.xlu1 %4793, %v3650_v45  }
 0x432   :  { %3659 = vperm.xlu0 %4777, %v3651_v44   ;;  %v4594_v44 = vpack.c.bf16 %v3717_v40, %v3716_v36 }
 0x483   :  { %v2971_v46 = vpop.permute.xlu1 %2970 }
 0x484   :  { %v2973_v47 = vpop.permute.xlu0 %2972 }
 0x485   :  { %v2974_v49 = vsel %vm546_vm3, %v2971_v46, %v2973_v47  ;;  %2983 = vmatprep.subr.mxu0 %v2973_v47  ;;  %vm4625_vm3 = vmpackc.low %vm2567_vm11, %vm4861_vm2  ;;  %vm3880_vm11 = vcmask 910080  }
 0x486   :  { %2984 = vmatpush1.msra.mxu0 %v2974_v49  ;;  %v3719_v49 = vld [vmem:[%s6277_s6 + $0x28] sm:$0xff] }
 0x487   :  { %v3068_v50 = vpop.permute.xlu1 %3067  ;;  %4350 = vmatmul.mubr.msk.f32.vlgmr.msra.gmra.mrb[4].mxu0 %vm2333_vm10, %v4348_v48  ;;  %v3718_v48 = vld [vmem:[%s6277_s6 + $0x20] sm:$0xff] }
 0x488   :  { %v3070_v51 = vpop.permute.xlu0 %3069  ;;  %3053 = vmatprep.mubr.f32.mxu0 %v4846_v5 }
 0x489   :  { %v3072_v53 = vsel %vm3071_vm13, %v3068_v50, %v3070_v51  ;;  %3081 = vmatprep.subr.mxu0 %v3070_v51 }
 0x48a   :  { %3082 = vmatpush1.msra.mxu0 %v3072_v53  ;;  %v4597_v53 = vpack.c.bf16 %v3719_v49, %v3718_v48 }
 0x48b   :  { %v3166_v54 = vpop.permute.xlu1 %3165  ;;  %4351 = vmatmul.mubr.msk.f32.gmra.mrb[6].mxu0 %vm2333_vm10, %v4349_v52 }
 0x48c   :  { %v3168_v57 = vpop.permute.xlu0 %3167  ;;  %3145 = vmatprep.mubr.f32.mxu0 %v4846_v5 }
 0x48d   :  { %v3169_v59 = vsel %vm2563_vm12, %v3166_v54, %v3168_v57  ;;  %3178 = vmatprep.subr.mxu0 %v3168_v57  ;;  %v3720_v57 = vld [vmem:[%s6277_s6 + $0x30] sm:$0xff]  ;;  %vm3887_vm12 = vcmask 1041280  }
 0x48f   :  { %v3263_v62 = vpop.permute.xlu1 %3262  ;;  %4354 = vmatmul.mubr.msk.f32.vlgmr.msra.gmra.mrb[4].mxu0 %vm2333_vm10, %v4352_v58  ;;  %v3721_v58 = vld [vmem:[%s6277_s6 + $0x38] sm:$0xff] }
 0x490   :  { %3179 = vmatpush1.msra.mxu0 %v3169_v59  ;;  %v3265_v56 = vpop.permute.xlu0 %3264  ;;  %3151 = vmatprep.mubr.f32.mxu0 %v4846_v5  ;;  %v4600_v59 = vpack.c.bf16 %v3721_v58, %v3720_v57 }
 0x491   :  { %3276 = vmatprep.subr.mxu0 %v3265_v56  ;;  %v3267_v7 = vsel %vm3266_vm14, %v3263_v62, %v3265_v56  ;;  %v3722_v62 = vld [vmem:[%s6277_s6 + $0x40] sm:$0xff]  ;;  %v3723_v56 = vld [vmem:[%s6277_s6 + $0x48] sm:$0xff]  ;;  %vm4125_vm14 = vcmask 254976  }
 0x493   :  { %v3361_v3 = vpop.permute.xlu1 %3360  ;;  %4355 = vmatmul.mubr.msk.f32.gmra.mrb[6].mxu0 %vm2333_vm10, %v4353_v2  ;;  %v4603_v2 = vpack.c.bf16 %v3723_v56, %v3722_v62 }
 0x494   :  { %v3363_v4 = vpop.permute.xlu0 %3362  ;;  %3242 = vmatprep.mubr.f32.mxu0 %v4846_v5 }
 0x495   :  { %v3364_v13 = vsel %vm1308_vm6, %v3361_v3, %v3363_v4  ;;  %v3724_v3 = vld [vmem:[%s6277_s6 + $0x50] sm:$0xff]  ;;  %vm3841_vm6 = vcmask 254080  }
 0x497   :  { %v3458_v8 = vpop.permute.xlu1 %3457  ;;  %4358 = vmatmul.mubr.msk.f32.vlgmr.msra.gmra.mrb[4].mxu0 %vm2333_vm10, %v4356_v6 }
 0x498   :  { %3277 = vmatpush1.msra.mxu0 %v3267_v7  ;;  %v3460_v60 = vpop.permute.xlu0 %3459  ;;  %3248 = vmatprep.mubr.f32.mxu0 %v4846_v5  ;;  %v3726_v7 = vld [vmem:[%s6277_s6 + $0x60] sm:$0xff] }
 0x499   :  { %3373 = vmatprep.subr.mxu0 %v3363_v4  ;;  %v3462_v18 = vsel %vm3461_vm15, %v3458_v8, %v3460_v60  ;;  %v3725_v4 = vld [vmem:[%s6277_s6 + $0x58] sm:$0xff]  ;;  %v3727_v8 = vld [vmem:[%s6277_s6 + $0x68] sm:$0xff] }
 0x49a   :  { %v4606_v6 = vpack.c.bf16 %v3725_v4, %v3724_v3  ;;  %v4021_v3 = vld [vmem:[%s6278_s7 + $0x80] sm:$0xff]  ;;  %v4022_v4 = vld [vmem:[%s6278_s7 + $0x88] sm:$0xff] }
 0x49b   :  { %v2795_v63 = vpop.permute.xlu1 %2794  ;;  %4359 = vmatmul.mubr.msk.f32.gmra.mrb[6].mxu0 %vm2333_vm10, %v4357_v55  ;;  %v3728_v55 = vld [vmem:[%s6277_s6 + $0x70] sm:$0xff] }
 0x49c   :  { %v2797_v17 = vpop.permute.xlu0 %2796  ;;  %3340 = vmatprep.mubr.f32.mxu0 %v4846_v5 }
 0x49d   :  { %v2798_v11 = vsel %vm68_vm0, %v2795_v63, %v2797_v17  ;;  %2807 = vmatprep.subr.mxu1 %v2797_v17  ;;  %v3729_v63 = vld [vmem:[%s6277_s6 + $0x78] sm:$0xff] }
 0x49e   :  { %2808 = vmatpush1.msra.mxu1 %v2798_v11  ;;  %v4612_v17 = vpack.c.bf16 %v3729_v63, %v3728_v55 }
 0x49f   :  { %4362 = vmatmul.mubr.msk.f32.vlgmr.msra.gmra.mrb[4].mxu0 %vm2333_vm10, %v4360_v9  ;;  %4344 = vmatmul.mubr.msk.f32.vlgmr.msra.gmra.mrb[6].mxu1 %vm2333_vm10, %v4342_v10  ;;  %v3556_v21 = vpop.permute.xlu1 %3555  ;;  %v3730_v9 = vld [vmem:[%s6277_s6 + $0x80] sm:$0xff]  ;;  %v3731_v10 = vld [vmem:[%s6277_s6 + $0x88] sm:$0xff] }
 0x4a0   :  { %3374 = vmatpush1.msra.mxu0 %v3364_v13  ;;  %3346 = vmatprep.mubr.f32.mxu0 %v4846_v5  ;;  %v3558_v19 = vpop.permute.xlu0 %3557  ;;  %v4615_v11 = vpack.c.bf16 %v3731_v10, %v3730_v9  ;;  %v3732_v13 = vld [vmem:[%s6277_s6 + $0x90] sm:$0xff]  ;;  %v4024_v9 = vld [vmem:[%s6278_s7 + $0x98] sm:$0xff] }
 0x4a1   :  { %3471 = vmatprep.subr.mxu0 %v3460_v60  ;;  %2877 = vmatprep.mubr.f32.mxu1 %v4846_v5  ;;  %v3560_v1 = vsel %vm3559_vm1, %v3556_v21, %v3558_v19  ;;  %v4609_v60 = vpack.c.bf16 %v3727_v8, %v3726_v7  ;;  %v3737_v21 = vld [vmem:[%s6277_s6 + $0xb8] sm:$0x1f]  ;;  %v4005_v7 = vld [vmem:[%s6278_s7] sm:$0xff]  ;;  %v4006_v8 = vld [vmem:[%s6278_s7 + $0x8] sm:$0xff] }
 0x4a2   :  { %4659 = vmatprep.subr.bf16.mxu1 %v4860_v38  ;;  %v4629_v63 = vpack.c.bf16 %v4006_v8, %v4005_v7 }
 0x4a3   :  { %4363 = vmatmul.mubr.msk.f32.gmra.mrb[6].mxu0 %vm2333_vm10, %v4361_v14  ;;  %4345 = vmatmul.mubr.msk.f32.gmra.mrb[8].mxu1 %vm2333_vm10, %v4343_v15  ;;  %v3733_v14 = vld [vmem:[%s6277_s6 + $0x98] sm:$0xff] }
 0x4a4   :  { %3437 = vmatprep.mubr.f32.mxu0 %v4846_v5  ;;  %v4618_v15 = vpack.c.bf16 %v3733_v14, %v3732_v13  ;;  %v4008_v13 = vld [vmem:[%s6278_s7 + $0x18] sm:$0xff] }
 0x4a7   :  { %4366 = vmatmul.mubr.msk.f32.vlgmr.msra.gmra.mrb[4].mxu0 %vm2333_vm10, %v4364_v16  ;;  %v3734_v16 = vld [vmem:[%s6277_s6 + $0xa0] sm:$0xff] }
 0x4a8   :  { %3472 = vmatpush1.msra.mxu0 %v3462_v18  ;;  %3443 = vmatprep.mubr.f32.mxu0 %v4846_v5  ;;  %v3735_v18 = vld [vmem:[%s6277_s6 + $0xa8] sm:$0xff] }
 0x4a9   :  { %3569 = vmatprep.subr.mxu0 %v3558_v19  ;;  %v4621_v19 = vpack.c.bf16 %v3735_v18, %v3734_v16  ;;  %v4025_v18 = vld [vmem:[%s6278_s7 + $0xa0] sm:$0xff] }
 0x4ab   :  { %4367 = vmatmul.mubr.msk.f32.gmra.mrb[6].mxu0 %vm2333_vm10, %v4365_v20  ;;  %v3736_v20 = vld [vmem:[%s6277_s6 + $0xb0] sm:$0xff] }
 0x4ac   :  { %3535 = vmatprep.mubr.f32.mxu0 %v4846_v5 }
 0x4af   :  { %4370 = vmatmul.mubr.msk.f32.vlgmr.msra.gmra.mrb[4].mxu0 %vm2333_vm10, %v4368_v22  ;;  %v4624_v22 = vpack.c.bf16 %v3737_v21, %v3736_v20  ;;  %v4009_v21 = vld [vmem:[%s6278_s7 + $0x20] sm:$0xff] }
 0x4b0   :  { %3570 = vmatpush1.msra.mxu0 %v3560_v1  ;;  %3541 = vmatprep.mubr.f32.mxu0 %v4846_v5  ;;  %v3655_v30 = vpop.permute.xlu1 %3654 }
 0x4b1   :  { %4590 = vmatprep.subr.bf16.mxu0 %v4860_v38  ;;  %v3660_v45 = vpop.permute.xlu0 %3659 }
 0x4b3   :  { %4371 = vmatmul.mubr.msk.f32.gmra.mrb[6].mxu0 %vm2333_vm10, %v4369_v23 }
 0x4b4   :  { %3633 = vmatprep.mubr.f32.mxu0 %v4846_v5 }
 0x4b7   :  { %4374 = vmatmul.mubr.msk.f32.vlgmr.msra.gmra.mrb[4].mxu0 %vm2333_vm10, %v4372_v24 }
 0x4b8   :  { %3639 = vmatprep.mubr.f32.mxu0 %v4846_v5  ;;  %4592 = vmatpush1.bf16.msra.mxu0 %v4591_v39 }
 0x4b9   :  { %4593 = vmatprep.subr.bf16.mxu0 %v4860_v38 }
 0x4bb   :  { %4375 = vmatmul.mubr.msk.f32.gmra.mrb[6].mxu0 %vm2333_vm10, %v4373_v25  ;;  %vm3874_vm10 = vcmask 778880  }
 0x4bc   :  { %4595 = vmatpush1.bf16.msra.mxu0 %v4594_v44 }
 0x4bd   :  { %4596 = vmatprep.subr.bf16.mxu0 %v4860_v38 }
 0x4c0   :  { %4598 = vmatpush1.bf16.msra.mxu0 %v4597_v53 }
 0x4c1   :  { %4599 = vmatprep.subr.bf16.mxu0 %v4860_v38 }
 0x4c4   :  { %4601 = vmatpush1.bf16.msra.mxu0 %v4600_v59 }
 0x4c5   :  { %4602 = vmatprep.subr.bf16.mxu0 %v4860_v38 }
 0x4c8   :  { %4604 = vmatpush1.bf16.msra.mxu0 %v4603_v2 }
 0x4c9   :  { %4605 = vmatprep.subr.bf16.mxu0 %v4860_v38 }
 0x4cc   :  { %4607 = vmatpush1.bf16.msra.mxu0 %v4606_v6  ;;  %v4627_v6 = vpack.c.bf16 %v4022_v4, %v4021_v3 }
 0x4cd   :  { %4608 = vmatprep.subr.bf16.mxu0 %v4860_v38 }
 0x4d0   :  { %4610 = vmatpush1.bf16.msra.mxu0 %v4609_v60 }
 0x4d1   :  { %4611 = vmatprep.subr.bf16.mxu0 %v4860_v38 }
 0x4d4   :  { %4613 = vmatpush1.bf16.msra.mxu0 %v4612_v17  ;;  %v4023_v17 = vld [vmem:[%s6278_s7 + $0x90] sm:$0xff] }
 0x4d5   :  { %4614 = vmatprep.subr.bf16.mxu0 %v4860_v38  ;;  %v4631_v10 = vpack.c.bf16 %v4024_v9, %v4023_v17 }
 0x4d8   :  { %4616 = vmatpush1.bf16.msra.mxu0 %v4615_v11  ;;  %v4007_v11 = vld [vmem:[%s6278_s7 + $0x10] sm:$0xff] }
 0x4d9   :  { %4617 = vmatprep.subr.bf16.mxu0 %v4860_v38  ;;  %v4633_v16 = vpack.c.bf16 %v4008_v13, %v4007_v11 }
 0x4dc   :  { %4619 = vmatpush1.bf16.msra.mxu0 %v4618_v15 }
 0x4dd   :  { %4620 = vmatprep.subr.bf16.mxu0 %v4860_v38 }
 0x4e0   :  { %4622 = vmatpush1.bf16.msra.mxu0 %v4621_v19  ;;  %v4026_v19 = vld [vmem:[%s6278_s7 + $0xa8] sm:$0xff] }
 0x4e1   :  { %4623 = vmatprep.subr.bf16.mxu0 %v4860_v38  ;;  %v4635_v20 = vpack.c.bf16 %v4026_v19, %v4025_v18 }
 0x4e4   :  { %4626 = vmatpush1.bf16.msk.msra.mxu0 %vm4625_vm3, %v4624_v22  ;;  %v4010_v22 = vld [vmem:[%s6278_s7 + $0x28] sm:$0xff] }
 0x4e5   :  { %4628 = vmatprep.subr.bf16.mxu0 %v4627_v6 }
 0x572   :  { %v2873_v26 = vpop.f32.mrb[6].mxu1 }
 0x573   :  { %v2875_v27 = vpop.f32.mrb[7].mxu1 }
 0x576   :  { %v2879_v28 = vpop.f32.mrb[8].mxu1 }
 0x577   :  { %v2881_v29 = vpop.f32.mrb[9].mxu1 }
 0x58a   :  { %v3635_v0 = vpop.f32.mrb[4].mxu0 }
 0x58b   :  { %v4667_v31 = vadd.f32 %v3635_v0, %v2873_v26  ;;  %v3637_v32 = vpop.f32.mrb[5].mxu0 }
 0x58c   :  { %v4668_v33 = vadd.f32 %v3637_v32, %v2875_v27 }
 0x58d   :  { %v5917_v37 = vadd.f32 %v4667_v31, %v3655_v30 }
 0x58e   :  { %v5924_v41 = vadd.f32 %v4668_v33, %v3655_v30  ;;  %v3641_v42 = vpop.f32.mrb[6].mxu0 }
 0x58f   :  { %v3666_v43 = vmax.f32 %v5917_v37, 0.0  ;;  %v4669_v61 = vadd.f32 %v3641_v42, %v2879_v28  ;;  %v3643_v12 = vpop.f32.mrb[7].mxu0  ;;  %v4862_v42 = vmov 1983009808  }
 0x590   :  { %v3667_v46 = vmax.f32 %v5924_v41, 0.0  ;;  %v4670_v47 = vadd.f32 %v3643_v12, %v2881_v29 }
 0x591   :  { %v5935_v50 = vadd.f32 %v4669_v61, %v3660_v45  ;;  %3674 = vrot.lane.b32.xlu1 %v3666_v43, %s4845_s17  ;;  %v3832_v61 = vlaneseq }
 0x592   :  { %v5940_v51 = vadd.f32 %v4670_v47, %v3660_v45  ;;  %3676 = vrot.lane.b32.xlu0 %v3667_v46, %s4845_s17 }
 0x593   :  { %v3668_v52 = vmax.f32 %v5935_v50, 0.0  ;;  %v3833_v44 = vshrl.u32 %v3832_v61, 7  ;;  %v4015_v61 = vld [vmem:[%s6278_s7 + $0x50] sm:$0xff] }
 0x594   :  { %v3669_v54 = vmax.f32 %v5940_v51, 0.0 }
 0x595   :  { %3678 = vrot.lane.b32.xlu1 %v3668_v52, %s4845_s17 }
 0x596   :  { %3680 = vrot.lane.b32.xlu0 %v3669_v54, %s4845_s17  ;;  %s4868_s17 = smov 96  }
 0x603   :  { %v3675_v1 = vpop.permute.xlu1 %3674 }
 0x604   :  { %v3677_v23 = vpop.permute.xlu0 %3676 }
 0x605   :  { %v3682_v24 = vsel %vm68_vm0, %v3675_v1, %v3677_v23  ;;  %v3689_v25 = vmax.f32 %v3667_v46, %v3677_v23 }
 0x606   :  { %v3688_v26 = vmax.f32 %v3666_v43, %v3682_v24  ;;  %v3830_v43 = vunpack.c.l.s4 %v4862_v42  ;;  %v4637_v24 = vpack.c.bf16 %v4010_v22, %v4009_v21  ;;  %v4032_v42 = vld [vmem:[%s6278_s7 + $0xd8] sm:$0xff] }
 0x607   :  { %v3679_v27 = vpop.permute.xlu1 %3678  ;;  %3698 = vrot.lane.b32.xlu0 %v3689_v25, %s4855_s3 }
 0x608   :  { %3696 = vrot.lane.b32.xlu1 %v3688_v26, %s4855_s3  ;;  %v3681_v28 = vpop.permute.xlu0 %3680  ;;  %v3831_v12 = vunpack.c.0.s8 %v3830_v43 }
 0x609   :  { %v3683_v29 = vsel %vm68_vm0, %v3679_v27, %v3681_v28  ;;  %v3691_v0 = vmax.f32 %v3669_v54, %v3681_v28  ;;  %vm3823_vm0 = vcmask 261120   ;;  %v4011_v28 = vld [vmem:[%s6278_s7 + $0x30] sm:$0xff] }
 0x60a   :  { %v3690_v30 = vmax.f32 %v3668_v52, %v3683_v29  ;;  %v3834_v45 = vsub.s32 %v3831_v12, %v3833_v44  ;;  %v4012_v29 = vld [vmem:[%s6278_s7 + $0x38] sm:$0xff] }
 0x60b   :  { %3702 = vrot.lane.b32.xlu0 %v3691_v0, %s4855_s3  ;;  %v4016_v12 = vld [vmem:[%s6278_s7 + $0x58] sm:$0xff] }
 0x60c   :  { %3700 = vrot.lane.b32.xlu1 %v3690_v30, %s4855_s3  ;;  %s4869_s3 = smov 80  }
 0x679   :  { %v3699_v31 = vpop.permute.xlu0 %3698 }
 0x67a   :  { %v3711_v32 = vmax.f32 %v3689_v25, %v3699_v31  ;;  %v3697_v33 = vpop.permute.xlu1 %3696  ;;  %v4027_v25 = vld [vmem:[%s6278_s7 + $0xb0] sm:$0xff] }
 0x67b   :  { %v3704_v34 = vsel %vm3071_vm13, %v3697_v33, %v3699_v31  ;;  %v4641_v31 = vpack.c.bf16 %v4012_v29, %v4011_v28  ;;  %v4030_v33 = vld [vmem:[%s6278_s7 + $0xc8] sm:$0xff] }
 0x67c   :  { %v3710_v35 = vmax.f32 %v3688_v26, %v3704_v34  ;;  %4377 = vmatprep.mubr.msk.f32.mxu0 %vm3738_vm4, %v3711_v32  ;;  %v4028_v26 = vld [vmem:[%s6278_s7 + $0xb8] sm:$0xff]  ;;  %v4029_v32 = vld [vmem:[%s6278_s7 + $0xc0] sm:$0xff] }
 0x67d   :  { %v3703_v36 = vpop.permute.xlu0 %3702  ;;  %v4639_v27 = vpack.c.bf16 %v4028_v26, %v4027_v25  ;;  %v4643_v34 = vpack.c.bf16 %v4030_v33, %v4029_v32  ;;  %v4129_v32 = vld [vmem:[%s6280_s9 + $0x8] sm:$0xff] }
 0x67e   :  { %v3713_v37 = vmax.f32 %v3691_v0, %v3703_v36  ;;  %v3701_v39 = vpop.permute.xlu1 %3700  ;;  %3813 = vmatmul.mubr.f32.vlgmr.msra.gmra.mrb[8].mxu0 %v3710_v35  ;;  %v4013_v35 = vld [vmem:[%s6278_s7 + $0x40] sm:$0xff] }
 0x67f   :  { %v3705_v40 = vsel %vm3071_vm13, %v3701_v39, %v3703_v36  ;;  %4630 = vmatpush3.bf16.msra.mxu0 %v4629_v63  ;;  %v4014_v36 = vld [vmem:[%s6278_s7 + $0x48] sm:$0xff]  ;;  %vm4870_vm13 = vmmov 0  }
 0x680   :  { %v3712_v41 = vmax.f32 %v3690_v30, %v3705_v40  ;;  %4378 = vmatprep.mubr.msk.f32.mxu0 %vm3738_vm4, %v3713_v37  ;;  %4632 = vmatprep.subr.bf16.mxu0 %v4631_v10  ;;  %v4645_v40 = vpack.c.bf16 %v4014_v36, %v4013_v35  ;;  %v4131_v35 = vld [vmem:[%s6280_s9 + $0x18] sm:$0xff] }
 0x681   :  { %4431 = vmatprep.mubr.msk.f32.mxu1 %vm4870_vm13, %v4846_v5 }
 0x682   :  { %3818 = vmatmul.mubr.f32.gmra.mrb[10].mxu0 %v3712_v41  ;;  %v4031_v41 = vld [vmem:[%s6278_s7 + $0xd0] sm:$0xff] }
 0x683   :  { %4634 = vmatpush3.bf16.msra.mxu0 %v4633_v16  ;;  %v4647_v43 = vpack.c.bf16 %v4032_v42, %v4031_v41 }
 0x684   :  { %4636 = vmatprep.subr.bf16.mxu0 %v4635_v20 }
 0x687   :  { %4638 = vmatpush3.bf16.msra.mxu0 %v4637_v24 }
 0x688   :  { %4640 = vmatprep.subr.bf16.mxu0 %v4639_v27 }
 0x68b   :  { %4642 = vmatpush3.bf16.msra.mxu0 %v4641_v31  ;;  %v4128_v31 = vld [vmem:[%s6280_s9] sm:$0xff] }
 0x68c   :  { %4644 = vmatprep.subr.bf16.mxu0 %v4643_v34  ;;  %v4660_v33 = vpack.c.bf16 %v4129_v32, %v4128_v31  ;;  %v4130_v34 = vld [vmem:[%s6280_s9 + $0x10] sm:$0xff]  ;;  %s4224_s9 = sshll.u32 %s4871_s15, 4  ;;  %s4225_s9 = int_to_ptr.vmem [resolvable:$true] %s4224_s9 }
 0x68d   :  { %v4663_v36 = vpack.c.bf16 %v4131_v35, %v4130_v34  ;;  %s4797_s16 = scalar_lea.vmem %s4225_s9, 32  ;;  %p4802_p1 = scmp.lt.s32.totalorder %s4225_s9, %s4225_s9 }
 0x68e   :  { %4661 = vmatpush3.bf16.msra.mxu1 %v4660_v33  ;;  %p4798_p0 = scmp.ne.s32.totalorder %s4225_s9, %s4797_s16  ;;  %p4803_p2 = scmp.lt.s32.totalorder %s4797_s16, %s4797_s16 }
 0x68f   :  { %4646 = vmatpush3.bf16.msra.mxu0 %v4645_v40  ;;  %4662 = vmatprep.subr.bf16.mxu1 %v4860_v38 }
 0x690   :  { %4648 = vmatprep.subr.bf16.mxu0 %v4647_v43  ;;  %p4804_p3 = por %p4803_p2, %p4802_p1 }
 0x692   :  { %4664 = vmatpush3.bf16.msra.mxu1 %v4663_v36  ;;  %p4805_p4 = pnand %p4804_p3, %p4798_p0 }
 0x751   :  { %v3814_v46 = vpop.f32.mrb[8].mxu0 }
 0x752   :  { %3824 = vst.msk [vmem:[%s6283_s12] sm:$0xff] %vm3823_vm0, %v3814_v46  ;;  %v3816_v47 = vpop.f32.mrb[9].mxu0  ;;  %v3835_v48 = vrot.slane %v3814_v46, %v3834_v45  ;;  %v3856_v53 = vcombine.high %v3814_v46, %v3814_v46 }
 0x753   :  { %3827 = vst.msk [vmem:[#allocation2] sm:$0x1] %vm3826_vm5, %v3814_v46  ;;  %v4649_v46 = vpack.c.bf16 %v4016_v12, %v4015_v61  ;;  %v4033_v47 = vld [vmem:[%s6278_s7 + $0xe0] sm:$0xff] }
 0x754   :  { %3944 = vrot.lane.b32.xlu1 %v3835_v48, %s4863_s4  ;;  %v3843_v51 = vcombine.high %v3835_v48, %v3835_v48  ;;  %v6049_v58 = vrot.slane %v3856_v53, %v3834_v45  ;;  %v3836_v62 = vrot.slane %v3835_v48, 7  ;;  %v4034_v48 = vld [vmem:[%s6278_s7 + $0xe8] sm:$0xff] }
 0x755   :  { %v3819_v49 = vpop.f32.mrb[10].mxu0  ;;  %4650 = vmatpush3.bf16.msra.mxu0 %v4649_v46 }
 0x756   :  { %3825 = vst.msk [vmem:[%s6283_s12 + $0x8] sm:$0xff] %vm3823_vm0, %v3819_v49  ;;  %v3821_v50 = vpop.f32.mrb[11].mxu0  ;;  %v3897_v52 = vrot.slane %v3819_v49, %v3834_v45  ;;  %v3915_v57 = vcombine.high %v3819_v49, %v3819_v49  ;;  %s4866_s12 = smov 64   ;;  %v6060_v56 = vrot.slane %v3836_v62, 2  ;;  %v6080_v60 = vcombine.high %v6049_v58, %v6049_v58  ;;  %v4019_v62 = vld [vmem:[%s6278_s7 + $0x70] sm:$0xff] }
 0x757   :  { %3889 = vst.msk [vmem:[#allocation2 + $0x2] sm:$0x1] %vm3826_vm5, %v3819_v49  ;;  %v3849_v15 = vrot.slane %v3843_v51, 7  ;;  %v3869_v30 = vrot.slane %v6049_v58, 7  ;;  %v4017_v49 = vld [vmem:[%s6278_s7 + $0x60] sm:$0xff]  ;;  %v4651_v50 = vpack.c.bf16 %v4034_v48, %v4033_v47 }
 0x758   :  { %3844 = vrot.lane.b32.xlu1 %v3843_v51, %s4864_s24  ;;  %3974 = vrot.lane.b32.xlu0 %v3897_v52, %s4863_s4  ;;  %v3904_v54 = vcombine.high %v3897_v52, %v3897_v52  ;;  %v6054_v59 = vrot.slane %v3915_v57, %v3834_v45  ;;  %v3898_v2 = vrot.slane %v3897_v52, 7  ;;  %v3882_v45 = vrot.slane %v6080_v60, 7  ;;  %v4035_v52 = vld [vmem:[%s6278_s7 + $0xf0] sm:$0xff] }
 0x759   :  { %v3850_v1 = vrot.slane %v3849_v15, 2  ;;  %v3870_v37 = vrot.slane %v3869_v30, 2  ;;  %4652 = vmatprep.subr.bf16.mxu0 %v4651_v50 }
 0x75a   :  { %v6082_v55 = vrot.slane %v3898_v2, 2  ;;  %v6102_v14 = vcombine.high %v6054_v59, %v6054_v59  ;;  %v3909_v23 = vrot.slane %v3904_v54, 7  ;;  %v3927_v39 = vrot.slane %v6054_v59, 7  ;;  %v4020_v2 = vld [vmem:[%s6278_s7 + $0x78] sm:$0xff] }
 0x75b   :  { %v3883_v57 = vrot.slane %v3882_v45, 2  ;;  %v4657_v3 = vpack.c.bf16 %v4020_v2, %v4019_v62 }
 0x75c   :  { %3950 = vrot.lane.b32.xlu1 %v3843_v51, %s4865_s25  ;;  %3905 = vrot.lane.b32.xlu0 %v3904_v54, %s4864_s24  ;;  %v3910_v0 = vrot.slane %v3909_v23, 2  ;;  %v3928_v44 = vrot.slane %v3927_v39, 2  ;;  %v4018_v51 = vld [vmem:[%s6278_s7 + $0x68] sm:$0xff]  ;;  %v4379_v39 = vld [vmem:[%s6279_s8] ss:$0 sm:$0xff] }
 0x75d   :  { %v4653_v53 = vpack.c.bf16 %v4018_v51, %v4017_v49 }
 0x75f   :  { %4654 = vmatpush3.bf16.msra.mxu0 %v4653_v53 }
 0x760   :  { %3864 = vrot.lane.b32.xlu1 %v6049_v58, %s4866_s12  ;;  %3980 = vrot.lane.b32.xlu0 %v3904_v54, %s4865_s25  ;;  %v4036_v54 = vld [vmem:[%s6278_s7 + $0xf8] sm:$0xff] }
 0x764   :  { %3958 = vrot.lane.b32.xlu1 %v6049_v58, %s4867_s22  ;;  %3923 = vrot.lane.b32.xlu0 %v6054_v59, %s4866_s12  ;;  %v3938_v58 = vrot.slane %v6102_v14, 7 }
 0x766   :  { %v3939_v4 = vrot.slane %v3938_v58, 2 }
 0x768   :  { %3838 = vrot.lane.b32.xlu1 %v6060_v56, %s4865_s25  ;;  %3988 = vrot.lane.b32.xlu0 %v6054_v59, %s4867_s22  ;;  %v4655_v59 = vpack.c.bf16 %v4036_v54, %v4035_v52 }
 0x76a   :  { %4656 = vmatprep.subr.bf16.mxu0 %v4655_v59 }
 0x76b   :  { %4658 = vmatpush3.bf16.msra.mxu0 %v4657_v3 }
 0x76c   :  { %3877 = vrot.lane.b32.xlu1 %v6080_v60, %s4868_s17  ;;  %3900 = vrot.lane.b32.xlu0 %v6082_v55, %s4865_s25 }
 0x770   :  { %3966 = vrot.lane.b32.xlu1 %v6080_v60, %s4869_s3  ;;  %3934 = vrot.lane.b32.xlu0 %v6102_v14, %s4868_s17 }
 0x774   :  { %3851 = vrot.lane.b32.xlu1 %v3850_v1, %s4867_s22  ;;  %3996 = vrot.lane.b32.xlu0 %v6102_v14, %s4869_s3 }
 0x778   :  { %3954 = vrot.lane.b32.xlu1 %v3850_v1, %s4864_s24  ;;  %3911 = vrot.lane.b32.xlu0 %v3910_v0, %s4867_s22 }
 0x77c   :  { %3871 = vrot.lane.b32.xlu1 %v3870_v37, %s4869_s3  ;;  %3984 = vrot.lane.b32.xlu0 %v3910_v0, %s4864_s24 }
 0x780   :  { %3962 = vrot.lane.b32.xlu1 %v3870_v37, %s4866_s12  ;;  %3929 = vrot.lane.b32.xlu0 %v3928_v44, %s4869_s3 }
 0x784   :  { %3884 = vrot.lane.b32.xlu1 %v3883_v57, %s4863_s4  ;;  %3992 = vrot.lane.b32.xlu0 %v3928_v44, %s4866_s12 }
 0x788   :  { %3970 = vrot.lane.b32.xlu1 %v3883_v57, %s4868_s17  ;;  %3940 = vrot.lane.b32.xlu0 %v3939_v4, %s4863_s4 }
 0x78c   :  { %4000 = vrot.lane.b32.xlu0 %v3939_v4, %s4868_s17 }
 0x7c6   :  { %v3945_v6 = vpop.permute.xlu1 %3944 }
 0x7c7   :  { %3947 = vst.msk [vmem:[#allocation2 + $0x1] sm:$0x1] %vm3826_vm5, %v3945_v6 }
 0x7c8   :  { %3949 = vst.msk [vmem:[#allocation2 + $0x1] sm:$0x1] %vm3841_vm6, %v6060_v56 }
 0x7ca   :  { %v3845_v7 = vpop.permute.xlu1 %3844  ;;  %v3975_v8 = vpop.permute.xlu0 %3974 }
 0x7cb   :  { %3977 = vst.msk [vmem:[#allocation2 + $0x3] sm:$0x1] %vm3826_vm5, %v3975_v8 }
 0x7cc   :  { %3979 = vst.msk [vmem:[#allocation2 + $0x3] sm:$0x1] %vm3841_vm6, %v6082_v55 }
 0x7ce   :  { %v3951_v60 = vpop.permute.xlu1 %3950  ;;  %v3906_v63 = vpop.permute.xlu0 %3905 }
 0x7cf   :  { %3953 = vst.msk [vmem:[#allocation2 + $0x1] sm:$0x1] %vm3847_vm7, %v3951_v60 }
 0x7d2   :  { %v3865_v17 = vpop.permute.xlu1 %3864  ;;  %v3981_v9 = vpop.permute.xlu0 %3980 }
 0x7d3   :  { %3983 = vst.msk [vmem:[#allocation2 + $0x3] sm:$0x1] %vm3847_vm7, %v3981_v9 }
 0x7d6   :  { %v3959_v10 = vpop.permute.xlu1 %3958  ;;  %v3924_v11 = vpop.permute.xlu0 %3923 }
 0x7da   :  { %v3839_v13 = vpop.permute.xlu1 %3838  ;;  %v3989_v56 = vpop.permute.xlu0 %3988 }
 0x7db   :  { %3842 = vst.msk [vmem:[#allocation2] sm:$0x1] %vm3841_vm6, %v3839_v13 }
 0x7dc   :  { %3848 = vst.msk [vmem:[#allocation2] sm:$0x1] %vm3847_vm7, %v3845_v7 }
 0x7de   :  { %v3878_v14 = vpop.permute.xlu1 %3877  ;;  %v3901_v15 = vpop.permute.xlu0 %3900 }
 0x7df   :  { %3903 = vst.msk [vmem:[#allocation2 + $0x2] sm:$0x1] %vm3841_vm6, %v3901_v15 }
 0x7e0   :  { %3908 = vst.msk [vmem:[#allocation2 + $0x2] sm:$0x1] %vm3847_vm7, %v3906_v63 }
 0x7e2   :  { %v3967_v55 = vpop.permute.xlu1 %3966  ;;  %v3935_v16 = vpop.permute.xlu0 %3934 }
 0x7e6   :  { %v3852_v18 = vpop.permute.xlu1 %3851  ;;  %v3997_v19 = vpop.permute.xlu0 %3996 }
 0x7e7   :  { %3855 = vst.msk [vmem:[#allocation2] sm:$0x1] %vm3854_vm8, %v3852_v18 }
 0x7e8   :  { %3868 = vst.msk [vmem:[#allocation2] sm:$0x1] %vm3867_vm9, %v3865_v17 }
 0x7ea   :  { %v3955_v20 = vpop.permute.xlu1 %3954  ;;  %v3912_v21 = vpop.permute.xlu0 %3911 }
 0x7eb   :  { %3957 = vst.msk [vmem:[#allocation2 + $0x1] sm:$0x1] %vm3854_vm8, %v3955_v20  ;;  %3914 = vst.msk [vmem:[#allocation2 + $0x2] sm:$0x1] %vm3854_vm8, %v3912_v21 }
 0x7ec   :  { %3926 = vst.msk [vmem:[#allocation2 + $0x2] sm:$0x1] %vm3867_vm9, %v3924_v11  ;;  %3961 = vst.msk [vmem:[#allocation2 + $0x1] sm:$0x1] %vm3867_vm9, %v3959_v10 }
 0x7ee   :  { %v3872_v22 = vpop.permute.xlu1 %3871  ;;  %v3985_v1 = vpop.permute.xlu0 %3984 }
 0x7ef   :  { %3875 = vst.msk [vmem:[#allocation2] sm:$0x1] %vm3874_vm10, %v3872_v22 }
 0x7f0   :  { %3987 = vst.msk [vmem:[#allocation2 + $0x3] sm:$0x1] %vm3854_vm8, %v3985_v1 }
 0x7f1   :  { %3991 = vst.msk [vmem:[#allocation2 + $0x3] sm:$0x1] %vm3867_vm9, %v3989_v56 }
 0x7f2   :  { %3881 = vst.msk [vmem:[#allocation2] sm:$0x1] %vm3880_vm11, %v3878_v14  ;;  %v3963_v23 = vpop.permute.xlu1 %3962  ;;  %v3930_v24 = vpop.permute.xlu0 %3929 }
 0x7f3   :  { %3965 = vst.msk [vmem:[#allocation2 + $0x1] sm:$0x1] %vm3874_vm10, %v3963_v23  ;;  %3932 = vst.msk [vmem:[#allocation2 + $0x2] sm:$0x1] %vm3874_vm10, %v3930_v24 }
 0x7f4   :  { %3937 = vst.msk [vmem:[#allocation2 + $0x2] sm:$0x1] %vm3880_vm11, %v3935_v16  ;;  %3969 = vst.msk [vmem:[#allocation2 + $0x1] sm:$0x1] %vm3880_vm11, %v3967_v55 }
 0x7f6   :  { %v3885_v25 = vpop.permute.xlu1 %3884  ;;  %v3993_v26 = vpop.permute.xlu0 %3992 }
 0x7f7   :  { %3888 = vst.msk [vmem:[#allocation2] sm:$0x1] %vm3887_vm12, %v3885_v25 }
 0x7f8   :  { %3995 = vst.msk [vmem:[#allocation2 + $0x3] sm:$0x1] %vm3874_vm10, %v3993_v26 }
 0x7f9   :  { %3999 = vst.msk [vmem:[#allocation2 + $0x3] sm:$0x1] %vm3880_vm11, %v3997_v19 }
 0x7fa   :  { %v3971_v27 = vpop.permute.xlu1 %3970  ;;  %v3941_v28 = vpop.permute.xlu0 %3940 }
 0x7fb   :  { %3973 = vst.msk [vmem:[#allocation2 + $0x1] sm:$0x1] %vm3887_vm12, %v3971_v27  ;;  %3943 = vst.msk [vmem:[#allocation2 + $0x2] sm:$0x1] %vm3887_vm12, %v3941_v28 }
 0x7fe   :  { %v4001_v29 = vpop.permute.xlu0 %4000 }
 0x7ff   :  { %4003 = vst.msk [vmem:[#allocation2 + $0x3] sm:$0x1] %vm3887_vm12, %v4001_v29 }
 0x806   :  { %v4380_v0 = vld.sshfl [vmem:[#allocation2] sm:$0x33 pattern:$0x76325410] }
 0x807   :  { %v4052_v30 = vcombine.high %v4380_v0, %v4380_v0 }
 0x809   :  { %4119 = vmatprep.mubr.f32.mxu0 %v4052_v30 }
 0x80a   :  { %4120 = vmatmul.mubr.f32.vlgmr.msra.gmra.mrb[12].mxu0 %v4380_v0 }
 0x8dd   :  { %v4415_v37 = vpop.f32.mrb[12].mxu0 }
 0x8de   :  { %v4416_v40 = vpop.f32.mrb[13].mxu0 }
 0x8df   :  { %v4417_v38 = vadd.f32 %v4416_v40, %v4415_v37 }
 0x8e1   :  { %v4122_v41 = vadd.f32 %v4417_v38, %v4379_v39 }
 0x8e3   :  { %v4127_v42 = vmax.f32 %v4122_v41, 0.0  ;;  %4126 = vst.msk [vmem:[#allocation3] sm:$0x3] %vm4125_vm14, %v4122_v41 }
 0x8e5   :  { %4432 = vmatmul.mubr.msk.f32.vlgmr.msra.gmra.mrb[10].mxu1 %vm3823_vm0, %v4127_v42 }
 0x8e6   :  { %4808 = shalt.err (!%p4805_p4)
}
 0x8e7   :  { %s4809_s18 = scalar_lea.hbm %s6284_s13, 32 }
 0x8e8   :  { %p4810_p5 = scmp.ne.s32.totalorder %s6284_s13, %s4809_s18  ;;  %p4813_p6 = scmp.lt.u32.totalorder %s4809_s18, %s6284_s13 }
 0x8ea   :  { %p4815_p7 = pnand %p4813_p6, %p4810_p5 }
 0x8ec   :  { %4818 = shalt.err (!%p4815_p7)
}
 0x8ed   :  { %4227 = dma.vmem_to_hbm [thread:$0]  %s4225_s9, 32, %s6284_s13, [#allocation4]   ;;  %v4381_v5 = vld [vmem:[%s6281_s10] ss:$0 sm:$0xff]  ;;  %vm4212_vm15 = vcmask 74752  }
 0x8ee   :  { %s4872_s3 = smov [#allocation5]  }
 0x8ef   :  { %s4234_s27 = sshll.u32 %s4872_s3, 4  ;;  %s4235_s27 = int_to_ptr.vmem [resolvable:$true] %s4234_s27 }
 0x8f0   :  { %s4819_s22 = scalar_lea.vmem %s4235_s27, 32  ;;  %p4824_p9 = scmp.lt.s32.totalorder %s4235_s27, %s4235_s27 }
 0x8f1   :  { %p4820_p8 = scmp.ne.s32.totalorder %s4235_s27, %s4819_s22  ;;  %p4825_p10 = scmp.lt.s32.totalorder %s4819_s22, %s4819_s22 }
 0x8f3   :  { %p4826_p11 = por %p4825_p10, %p4824_p9 }
 0x8f5   :  { %p4827_p12 = pnand %p4826_p11, %p4820_p8 }
 0x9b8   :  { %v4208_v43 = vpop.f32.mrb[10].mxu1 }
 0x9b9   :  { %v4209_v61 = vadd.f32 %v4381_v5, %v4208_v43  ;;  %v4433_v12 = vpop.f32.mrb[11].mxu1 }
 0x9bb   :  { %4213 = vst.msk [vmem:[#allocation5] sm:$0x3] %vm4212_vm15, %v4209_v61 }
 0x9bc   :  { %4830 = shalt.err (!%p4827_p12)
}
 0x9bd   :  { %s4831_s7 = scalar_lea.hbm %s6285_s14, 32 }
 0x9be   :  { %p4832_p13 = scmp.ne.s32.totalorder %s6285_s14, %s4831_s7  ;;  %p4835_p0 = scmp.lt.u32.totalorder %s4831_s7, %s6285_s14 }
 0x9c0   :  { %p4837_p1 = pnand %p4835_p0, %p4832_p13 }
 0x9c2   :  { %4840 = shalt.err (!%p4837_p1)
}
 0x9c3   :  { %4237 = dma.vmem_to_hbm [thread:$0]  %s4235_s27, 32, %s6285_s14, [#allocation6]  }
 0x9c4   :  { %4841 = dma.done.wait [#allocation4], 32  }
 0x9c5   :  { %4842 = vsyncadd [#allocation4], 4294967264 }
 0x9c6   :  { %4843 = dma.done.wait [#allocation6], 32  }
 0x9c7   :  { %4844 = vsyncadd [#allocation6], 4294967264 }
 0x9c8   :  { %4248 = vsyncpa [#allocation4], 1 }
 0x9c9   :  { %4249 = vsyncpa [#allocation6], 1 }

</bundles_post_ra>
